<compile_context>
chip_gen: v6e
topology: v6e:2x2x1
jax: 0.10.0
libtpu: 0.0.40
codegen_flags: <defaults>
</compile_context>

<pallas_src>
import jax
import jax.numpy as jnp
import numpy as np
from jax.experimental import pallas as pl
from jax.experimental.pallas import tpu as pltpu


def gru_kernel(g_ref, h0_ref, len_ref, whh_ref, bhn_ref, wout_ref, bout_ref,
               out_ref, hid_ref, h_sc):
    c = pl.program_id(1)                       # time-chunk index ("arbitrary")
    n_chunks = pl.num_programs(1)
    TC = g_ref.shape[0]
    Hp = h_sc.shape[1]

    @pl.when(c == 0)
    def _():
        h_sc[...] = h0_ref[...]

    # Hoist loop-invariant loads out of the time loop.
    lens = len_ref[...]                        # (TB, 1) int32 valid lengths
    whh = whh_ref[...]                         # (Hp, 3*Hp) fused hidden weights
    b_hn = bhn_ref[...]                        # (1, Hp)
    t0 = c * TC

    def step(i, h):
        g = g_ref[i]                           # (TB, 3*Hp) precomputed input gates
        hdot = jnp.dot(h, whh, preferred_element_type=jnp.float32)  # one MXU op
        r = jax.nn.sigmoid(g[:, :Hp] + hdot[:, :Hp])
        z = jax.nn.sigmoid(g[:, Hp:2 * Hp] + hdot[:, Hp:2 * Hp])
        n = jnp.tanh(g[:, 2 * Hp:] + r * (hdot[:, 2 * Hp:] + b_hn))
        h_new = (1.0 - z) * n + z * h
        # Freeze h once past each row's valid length (packed-sequence semantics):
        # at the end, h == hidden at t = lengths[b]-1.
        valid = (t0 + i) < lens                # (TB, 1) bool
        return jnp.where(valid, h_new, h)

    h = jax.lax.fori_loop(0, TC, step, h_sc[...], unroll=True)
    h_sc[...] = h

    @pl.when(c == n_chunks - 1)
    def _():
        logits = jnp.dot(h, wout_ref[...],
                         preferred_element_type=jnp.float32) + bout_ref[...]
        m = jnp.max(logits, axis=-1, keepdims=True)
        lse = jnp.log(jnp.sum(jnp.exp(logits - m), axis=-1, keepdims=True)) + m
        out_ref[...] = logits - lse            # LogSoftmax (padded cols ~ -inf)
        hid_ref[...] = h


def _round_up(x, m):
    return (x + m - 1) // m * m


def rnn_forward(x_btI, h0, lengths, params, *, time_chunk=16):
    """x_btI: (B, T, I) f32 (batch_first), h0: (1, B, H), lengths: (B,) int."""
    B, T, I = x_btI.shape
    H = h0.shape[-1]
    O = params["w_out"].shape[0]
    f32 = jnp.float32

    # ---- hardware-friendly padded sizes -------------------------------------
    Hp = _round_up(H, 128)                     # lane-dense hidden
    Op = _round_up(O, 128)                     # lane-dense output head
    if B <= 8:
        TB, n_btiles = 8, 1
    else:                                      # two tiles -> both v7x TensorCores
        TB = _round_up((B + 1) // 2, 8)
        n_btiles = 2
    Bp = TB * n_btiles
    TC = min(time_chunk, T)
    Tp = _round_up(T, TC)
    n_tchunks = Tp // TC

    # ---- split / transpose / pad PyTorch GRU weights (gate order r, z, n) ---
    w_ih, w_hh = params["w_ih"].astype(f32), params["w_hh"].astype(f32)
    b_ih, b_hh = params["b_ih"].astype(f32), params["b_hh"].astype(f32)

    def gate(w, k):
        return w[k * H:(k + 1) * H]

    def padc(a, cols):
        return jnp.pad(a, ((0, 0), (0, cols - a.shape[1])))

    def padv(v):
        return jnp.pad(v, (0, Hp - H))

    # input projection weights, (I, 3*Hp)
    wih_all = jnp.concatenate([padc(gate(w_ih, k).T, Hp) for k in range(3)], axis=1)
    # fused hidden projection weights, (Hp, 3*Hp)
    whh_all = jnp.concatenate(
        [jnp.pad(gate(w_hh, k).T, ((0, Hp - H), (0, Hp - H))) for k in range(3)],
        axis=1)
    # fold b_ir+b_hr and b_iz+b_hz into the precomputed gates; keep b_hn apart.
    g_bias = jnp.concatenate([padv(gate(b_ih, 0) + gate(b_hh, 0)),
                              padv(gate(b_ih, 1) + gate(b_hh, 1)),
                              padv(gate(b_ih, 2))])                # (3*Hp,)
    b_hn = padv(gate(b_hh, 2)).reshape(1, Hp)

    # output head; padded columns get a huge negative bias so log-softmax
    # over the padded width matches log-softmax over the real O columns.
    w_out_T = jnp.pad(params["w_out"].astype(f32).T, ((0, Hp - H), (0, Op - O)))
    b_out = jnp.concatenate([params["b_out"].astype(f32),
                             jnp.full((Op - O,), -1e30, f32)]).reshape(1, Op)

    # ---- hoisted input-side GEMM: all timesteps at once (fully parallel) ----
    x_pad = jnp.pad(x_btI.astype(f32), ((0, Bp - B), (0, Tp - T), (0, 0)))
    gates = jnp.einsum("bti,ig->tbg", x_pad, wih_all) + g_bias     # (Tp, Bp, 3*Hp)

    h0_pad = jnp.pad(h0[0].astype(f32), ((0, Bp - B), (0, Hp - H)))
    lens = jnp.clip(lengths.astype(jnp.int32), 1, T)               # guard lengths
    lens = jnp.pad(lens, (0, Bp - B), constant_values=1).reshape(Bp, 1)

    G3 = 3 * Hp
    grid_spec = pltpu.PrefetchScalarGridSpec(
        num_scalar_prefetch=0,
        grid=(n_btiles, n_tchunks),
        in_specs=[
            pl.BlockSpec((TC, TB, G3), lambda b, c: (c, b, 0)),    # gate chunk
            pl.BlockSpec((TB, Hp), lambda b, c: (b, 0)),           # h0
            pl.BlockSpec((TB, 1), lambda b, c: (b, 0)),            # lengths
            pl.BlockSpec((Hp, G3), lambda b, c: (0, 0)),           # fused W_hh^T
            pl.BlockSpec((1, Hp), lambda b, c: (0, 0)),            # b_hn
            pl.BlockSpec((Hp, Op), lambda b, c: (0, 0)),           # W_out^T
            pl.BlockSpec((1, Op), lambda b, c: (0, 0)),            # b_out
        ],
        out_specs=[pl.BlockSpec((TB, Op), lambda b, c: (b, 0)),
                   pl.BlockSpec((TB, Hp), lambda b, c: (b, 0))],
        scratch_shapes=[pltpu.VMEM((TB, Hp), f32)],                # running hidden
    )

    out2d, hid2d = pl.pallas_call(
        gru_kernel,
        out_shape=(jax.ShapeDtypeStruct((Bp, Op), f32),
                   jax.ShapeDtypeStruct((Bp, Hp), f32)),
        grid_spec=grid_spec,
        compiler_params=pltpu.CompilerParams(
            dimension_semantics=("parallel", "arbitrary")),
    )(gates, h0_pad, lens, whh_all, b_hn, w_out_T, b_out)

    output = out2d[:B, :O].reshape(B, 1, O)    # matches (batch, 1, output_size)
    hidden = hid2d[:B, :H].reshape(1, B, H)    # matches (num_layers, batch, hidden)
    return output, hidden


def rnn_reference(x_btI, h0, lengths, params):
    """Pure-JAX reference mirroring the PyTorch module semantics."""
    B, T, I = x_btI.shape
    H = h0.shape[-1]
    w_ih, w_hh, b_ih, b_hh = (params[k] for k in ("w_ih", "w_hh", "b_ih", "b_hh"))

    def step(h, x_t):
        gi = x_t @ w_ih.T + b_ih
        gh = h @ w_hh.T + b_hh
        i_r, i_z, i_n = jnp.split(gi, 3, axis=-1)
        h_r, h_z, h_n = jnp.split(gh, 3, axis=-1)
        r = jax.nn.sigmoid(i_r + h_r)
        z = jax.nn.sigmoid(i_z + h_z)
        n = jnp.tanh(i_n + r * h_n)
        h_new = (1.0 - z) * n + z * h
        return h_new, h_new

    _, hs = jax.lax.scan(step, h0[0], jnp.transpose(x_btI, (1, 0, 2)))  # (T,B,H)
    chosen = hs[lengths - 1, jnp.arange(B)]                             # (B, H)
    logits = chosen @ params["w_out"].T + params["b_out"]
    logp = jax.nn.log_softmax(logits, axis=-1)
    return logp.reshape(B, 1, -1), chosen.reshape(1, B, H)


if __name__ == "__main__":
    # Small shapes consistent with the module's forward.
    B, T, I, H, O = 2, 8, 16, 32, 10

    key = jax.random.PRNGKey(0)
    ks = jax.random.split(key, 8)
    params = {
        "w_ih": 0.2 * jax.random.normal(ks[0], (3 * H, I), jnp.float32),
        "w_hh": 0.2 * jax.random.normal(ks[1], (3 * H, H), jnp.float32),
        "b_ih": 0.1 * jax.random.normal(ks[2], (3 * H,), jnp.float32),
        "b_hh": 0.1 * jax.random.normal(ks[3], (3 * H,), jnp.float32),
        "w_out": 0.2 * jax.random.normal(ks[4], (O, H), jnp.float32),
        "b_out": 0.1 * jax.random.normal(ks[5], (O,), jnp.float32),
    }
    x = jax.random.normal(ks[6], (B, T, I), jnp.float32)     # batch_first input
    h0 = jnp.zeros((1, B, H), jnp.float32)                   # init_hidden(batch)
    lengths = jnp.array([T, 5], dtype=jnp.int32)             # valid lengths per row

    out, hid = jax.block_until_ready(rnn_forward(x, h0, lengths, params))
    out_ref, hid_ref = rnn_reference(x, h0, lengths, params)

    np.testing.assert_allclose(np.asarray(out), np.asarray(out_ref), rtol=1e-4, atol=1e-4)
    np.testing.assert_allclose(np.asarray(hid), np.asarray(hid_ref), rtol=1e-4, atol=1e-4)
    assert out.shape == (B, 1, O) and hid.shape == (1, B, H)

    print("KERNEL_OK")
</pallas_src>

<mosaic_0001>
module attributes {stable_mosaic.version = 11 : i64} {
  func.func @gru_kernel(%arg0: i32, %arg1: i32, %arg2: memref<8x8x384xf32, #tpu.memory_space<vmem>>, %arg3: memref<8x128xf32, #tpu.memory_space<vmem>>, %arg4: memref<8x1xi32, #tpu.memory_space<vmem>>, %arg5: memref<128x384xf32, #tpu.memory_space<vmem>>, %arg6: memref<1x128xf32, #tpu.memory_space<vmem>>, %arg7: memref<128x128xf32, #tpu.memory_space<vmem>>, %arg8: memref<1x128xf32, #tpu.memory_space<vmem>>, %arg9: memref<8x128xf32, #tpu.memory_space<vmem>>, %arg10: memref<8x128xf32, #tpu.memory_space<vmem>>, %arg11: memref<8x128xf32, #tpu.memory_space<vmem>>) attributes {dimension_semantics = [#tpu.dimension_semantics<parallel>, #tpu.dimension_semantics<arbitrary>], iteration_bounds = array<i64: 1, 1>, scalar_prefetch = 0 : i64, scratch_operands = 1 : i64, tpu.core_type = #tpu.core_type<tc>, window_params = [{transform_indices = @transform_0, window_bounds = array<i64: 8, 8, 384>}, {transform_indices = @transform_1, window_bounds = array<i64: 8, 128>}, {transform_indices = @transform_2, window_bounds = array<i64: 8, 1>}, {pipeline_mode = #tpu.pipeline_mode<synchronous>, transform_indices = @transform_3, window_bounds = array<i64: 128, 384>}, {pipeline_mode = #tpu.pipeline_mode<synchronous>, transform_indices = @transform_4, window_bounds = array<i64: 1, 128>}, {pipeline_mode = #tpu.pipeline_mode<synchronous>, transform_indices = @transform_5, window_bounds = array<i64: 128, 128>}, {pipeline_mode = #tpu.pipeline_mode<synchronous>, transform_indices = @transform_6, window_bounds = array<i64: 1, 128>}, {transform_indices = @transform_7, window_bounds = array<i64: 8, 128>}, {transform_indices = @transform_8, window_bounds = array<i64: 8, 128>}]} {
    %c0_i32 = arith.constant 0 : i32
    %0 = arith.cmpi eq, %arg1, %c0_i32 : i32
    %1 = arith.extui %0 : i1 to i32
    %c0_i32_0 = arith.constant 0 : i32
    %2 = arith.cmpi ne, %1, %c0_i32_0 : i32
    scf.if %2 {
      %c0_61 = arith.constant 0 : index
      %c0_62 = arith.constant 0 : index
      %316 = vector.load %arg3[%c0_61, %c0_62] : memref<8x128xf32, #tpu.memory_space<vmem>>, vector<8x128xf32>
      %c0_63 = arith.constant 0 : index
      %c0_64 = arith.constant 0 : index
      %317 = vector.load %arg11[%c0_63, %c0_64] : memref<8x128xf32, #tpu.memory_space<vmem>>, vector<8x128xf32>
      tpu.vector_store %arg11[%c0_63, %c0_64], %316 {strides = array<i32>} : memref<8x128xf32, #tpu.memory_space<vmem>>, vector<8x128xf32>,
    } else {
    }
    %c0 = arith.constant 0 : index
    %c0_1 = arith.constant 0 : index
    %3 = vector.load %arg4[%c0, %c0_1] : memref<8x1xi32, #tpu.memory_space<vmem>>, vector<8x1xi32>
    %c0_2 = arith.constant 0 : index
    %c0_3 = arith.constant 0 : index
    %4 = vector.load %arg5[%c0_2, %c0_3] : memref<128x384xf32, #tpu.memory_space<vmem>>, vector<128x384xf32>
    %c0_4 = arith.constant 0 : index
    %c0_5 = arith.constant 0 : index
    %5 = vector.load %arg6[%c0_4, %c0_5] : memref<1x128xf32, #tpu.memory_space<vmem>>, vector<1x128xf32>
    %c8_i32 = arith.constant 8 : i32
    %6 = arith.muli %arg1, %c8_i32 : i32
    %c0_6 = arith.constant 0 : index
    %c0_7 = arith.constant 0 : index
    %7 = vector.load %arg11[%c0_6, %c0_7] : memref<8x128xf32, #tpu.memory_space<vmem>>, vector<8x128xf32>
    %c0_i32_8 = arith.constant 0 : i32
    %8 = arith.index_cast %c0_i32_8 : i32 to index
    %c0_9 = arith.constant 0 : index
    %c0_10 = arith.constant 0 : index
    %9 = vector.load %arg2[%8, %c0_9, %c0_10] : memref<8x8x384xf32, #tpu.memory_space<vmem>>, vector<1x8x384xf32>
    %10 = vector.shape_cast %9 : vector<1x8x384xf32> to vector<8x384xf32>
    %cst = arith.constant dense<0.000000e+00> : vector<8x384xf32>
    %11 = tpu.matmul %7, %4, %cst {dimension_numbers = #tpu.dot_dimension_numbers<[1], [0], [0], [1], [0, 0, 1, 1], [], []>} : vector<8x128xf32>, vector<128x384xf32>, vector<8x384xf32> -> vector<8x384xf32>
    %12 = vector.extract_strided_slice %10 {offsets = [0, 0], sizes = [8, 128], strides = [1, 1]} : vector<8x384xf32> to vector<8x128xf32>
    %13 = vector.extract_strided_slice %11 {offsets = [0, 0], sizes = [8, 128], strides = [1, 1]} : vector<8x384xf32> to vector<8x128xf32>
    %14 = arith.addf %12, %13 : vector<8x128xf32>
    %15 = arith.negf %14 : vector<8x128xf32>
    %16 = math.exp %15 : vector<8x128xf32>
    %cst_11 = arith.constant 1.000000e+00 : f32
    %17 = vector.broadcast %cst_11 : f32 to vector<8x128xf32>
    %18 = arith.addf %17, %16 : vector<8x128xf32>
    %19 = arith.divf %17, %18 : vector<8x128xf32>
    %20 = vector.extract_strided_slice %10 {offsets = [0, 128], sizes = [8, 128], strides = [1, 1]} : vector<8x384xf32> to vector<8x128xf32>
    %21 = vector.extract_strided_slice %11 {offsets = [0, 128], sizes = [8, 128], strides = [1, 1]} : vector<8x384xf32> to vector<8x128xf32>
    %22 = arith.addf %20, %21 : vector<8x128xf32>
    %23 = arith.negf %22 : vector<8x128xf32>
    %24 = math.exp %23 : vector<8x128xf32>
    %cst_12 = arith.constant 1.000000e+00 : f32
    %25 = vector.broadcast %cst_12 : f32 to vector<8x128xf32>
    %26 = arith.addf %25, %24 : vector<8x128xf32>
    %27 = arith.divf %25, %26 : vector<8x128xf32>
    %28 = vector.extract_strided_slice %10 {offsets = [0, 256], sizes = [8, 128], strides = [1, 1]} : vector<8x384xf32> to vector<8x128xf32>
    %29 = vector.extract_strided_slice %11 {offsets = [0, 256], sizes = [8, 128], strides = [1, 1]} : vector<8x384xf32> to vector<8x128xf32>
    %30 = vector.broadcast %5 : vector<1x128xf32> to vector<8x128xf32>
    %31 = arith.addf %29, %30 : vector<8x128xf32>
    %32 = arith.mulf %19, %31 : vector<8x128xf32>
    %33 = arith.addf %28, %32 : vector<8x128xf32>
    %34 = math.tanh %33 : vector<8x128xf32>
    %cst_13 = arith.constant 1.000000e+00 : f32
    %35 = vector.broadcast %cst_13 : f32 to vector<8x128xf32>
    %36 = arith.subf %35, %27 : vector<8x128xf32>
    %37 = arith.mulf %36, %34 : vector<8x128xf32>
    %38 = arith.mulf %27, %7 : vector<8x128xf32>
    %39 = arith.addf %37, %38 : vector<8x128xf32>
    %40 = arith.addi %6, %c0_i32_8 : i32
    %41 = vector.broadcast %40 : i32 to vector<8x1xi32>
    %42 = arith.cmpi slt, %41, %3 : vector<8x1xi32>
    %43 = vector.shape_cast %42 : vector<8x1xi1> to vector<8x1xi1>
    %44 = vector.broadcast %43 : vector<8x1xi1> to vector<8x128xi1>
    %45 = arith.select %44, %39, %7 : vector<8x128xi1>, vector<8x128xf32>
    %c1_i32 = arith.constant 1 : i32
    %46 = arith.index_cast %c1_i32 : i32 to index
    %c0_14 = arith.constant 0 : index
    %c0_15 = arith.constant 0 : index
    %47 = vector.load %arg2[%46, %c0_14, %c0_15] : memref<8x8x384xf32, #tpu.memory_space<vmem>>, vector<1x8x384xf32>
    %48 = vector.shape_cast %47 : vector<1x8x384xf32> to vector<8x384xf32>
    %cst_16 = arith.constant dense<0.000000e+00> : vector<8x384xf32>
    %49 = tpu.matmul %45, %4, %cst_16 {dimension_numbers = #tpu.dot_dimension_numbers<[1], [0], [0], [1], [0, 0, 1, 1], [], []>} : vector<8x128xf32>, vector<128x384xf32>, vector<8x384xf32> -> vector<8x384xf32>
    %50 = vector.extract_strided_slice %48 {offsets = [0, 0], sizes = [8, 128], strides = [1, 1]} : vector<8x384xf32> to vector<8x128xf32>
    %51 = vector.extract_strided_slice %49 {offsets = [0, 0], sizes = [8, 128], strides = [1, 1]} : vector<8x384xf32> to vector<8x128xf32>
    %52 = arith.addf %50, %51 : vector<8x128xf32>
    %53 = arith.negf %52 : vector<8x128xf32>
    %54 = math.exp %53 : vector<8x128xf32>
    %cst_17 = arith.constant 1.000000e+00 : f32
    %55 = vector.broadcast %cst_17 : f32 to vector<8x128xf32>
    %56 = arith.addf %55, %54 : vector<8x128xf32>
    %57 = arith.divf %55, %56 : vector<8x128xf32>
    %58 = vector.extract_strided_slice %48 {offsets = [0, 128], sizes = [8, 128], strides = [1, 1]} : vector<8x384xf32> to vector<8x128xf32>
    %59 = vector.extract_strided_slice %49 {offsets = [0, 128], sizes = [8, 128], strides = [1, 1]} : vector<8x384xf32> to vector<8x128xf32>
    %60 = arith.addf %58, %59 : vector<8x128xf32>
    %61 = arith.negf %60 : vector<8x128xf32>
    %62 = math.exp %61 : vector<8x128xf32>
    %cst_18 = arith.constant 1.000000e+00 : f32
    %63 = vector.broadcast %cst_18 : f32 to vector<8x128xf32>
    %64 = arith.addf %63, %62 : vector<8x128xf32>
    %65 = arith.divf %63, %64 : vector<8x128xf32>
    %66 = vector.extract_strided_slice %48 {offsets = [0, 256], sizes = [8, 128], strides = [1, 1]} : vector<8x384xf32> to vector<8x128xf32>
    %67 = vector.extract_strided_slice %49 {offsets = [0, 256], sizes = [8, 128], strides = [1, 1]} : vector<8x384xf32> to vector<8x128xf32>
    %68 = vector.broadcast %5 : vector<1x128xf32> to vector<8x128xf32>
    %69 = arith.addf %67, %68 : vector<8x128xf32>
    %70 = arith.mulf %57, %69 : vector<8x128xf32>
    %71 = arith.addf %66, %70 : vector<8x128xf32>
    %72 = math.tanh %71 : vector<8x128xf32>
    %cst_19 = arith.constant 1.000000e+00 : f32
    %73 = vector.broadcast %cst_19 : f32 to vector<8x128xf32>
    %74 = arith.subf %73, %65 : vector<8x128xf32>
    %75 = arith.mulf %74, %72 : vector<8x128xf32>
    %76 = arith.mulf %65, %45 : vector<8x128xf32>
    %77 = arith.addf %75, %76 : vector<8x128xf32>
    %78 = arith.addi %6, %c1_i32 : i32
    %79 = vector.broadcast %78 : i32 to vector<8x1xi32>
    %80 = arith.cmpi slt, %79, %3 : vector<8x1xi32>
    %81 = vector.shape_cast %80 : vector<8x1xi1> to vector<8x1xi1>
    %82 = vector.broadcast %81 : vector<8x1xi1> to vector<8x128xi1>
    %83 = arith.select %82, %77, %45 : vector<8x128xi1>, vector<8x128xf32>
    %c2_i32 = arith.constant 2 : i32
    %84 = arith.index_cast %c2_i32 : i32 to index
    %c0_20 = arith.constant 0 : index
    %c0_21 = arith.constant 0 : index
    %85 = vector.load %arg2[%84, %c0_20, %c0_21] : memref<8x8x384xf32, #tpu.memory_space<vmem>>, vector<1x8x384xf32>
    %86 = vector.shape_cast %85 : vector<1x8x384xf32> to vector<8x384xf32>
    %cst_22 = arith.constant dense<0.000000e+00> : vector<8x384xf32>
    %87 = tpu.matmul %83, %4, %cst_22 {dimension_numbers = #tpu.dot_dimension_numbers<[1], [0], [0], [1], [0, 0, 1, 1], [], []>} : vector<8x128xf32>, vector<128x384xf32>, vector<8x384xf32> -> vector<8x384xf32>
    %88 = vector.extract_strided_slice %86 {offsets = [0, 0], sizes = [8, 128], strides = [1, 1]} : vector<8x384xf32> to vector<8x128xf32>
    %89 = vector.extract_strided_slice %87 {offsets = [0, 0], sizes = [8, 128], strides = [1, 1]} : vector<8x384xf32> to vector<8x128xf32>
    %90 = arith.addf %88, %89 : vector<8x128xf32>
    %91 = arith.negf %90 : vector<8x128xf32>
    %92 = math.exp %91 : vector<8x128xf32>
    %cst_23 = arith.constant 1.000000e+00 : f32
    %93 = vector.broadcast %cst_23 : f32 to vector<8x128xf32>
    %94 = arith.addf %93, %92 : vector<8x128xf32>
    %95 = arith.divf %93, %94 : vector<8x128xf32>
    %96 = vector.extract_strided_slice %86 {offsets = [0, 128], sizes = [8, 128], strides = [1, 1]} : vector<8x384xf32> to vector<8x128xf32>
    %97 = vector.extract_strided_slice %87 {offsets = [0, 128], sizes = [8, 128], strides = [1, 1]} : vector<8x384xf32> to vector<8x128xf32>
    %98 = arith.addf %96, %97 : vector<8x128xf32>
    %99 = arith.negf %98 : vector<8x128xf32>
    %100 = math.exp %99 : vector<8x128xf32>
    %cst_24 = arith.constant 1.000000e+00 : f32
    %101 = vector.broadcast %cst_24 : f32 to vector<8x128xf32>
    %102 = arith.addf %101, %100 : vector<8x128xf32>
    %103 = arith.divf %101, %102 : vector<8x128xf32>
    %104 = vector.extract_strided_slice %86 {offsets = [0, 256], sizes = [8, 128], strides = [1, 1]} : vector<8x384xf32> to vector<8x128xf32>
    %105 = vector.extract_strided_slice %87 {offsets = [0, 256], sizes = [8, 128], strides = [1, 1]} : vector<8x384xf32> to vector<8x128xf32>
    %106 = vector.broadcast %5 : vector<1x128xf32> to vector<8x128xf32>
    %107 = arith.addf %105, %106 : vector<8x128xf32>
    %108 = arith.mulf %95, %107 : vector<8x128xf32>
    %109 = arith.addf %104, %108 : vector<8x128xf32>
    %110 = math.tanh %109 : vector<8x128xf32>
    %cst_25 = arith.constant 1.000000e+00 : f32
    %111 = vector.broadcast %cst_25 : f32 to vector<8x128xf32>
    %112 = arith.subf %111, %103 : vector<8x128xf32>
    %113 = arith.mulf %112, %110 : vector<8x128xf32>
    %114 = arith.mulf %103, %83 : vector<8x128xf32>
    %115 = arith.addf %113, %114 : vector<8x128xf32>
    %116 = arith.addi %6, %c2_i32 : i32
    %117 = vector.broadcast %116 : i32 to vector<8x1xi32>
    %118 = arith.cmpi slt, %117, %3 : vector<8x1xi32>
    %119 = vector.shape_cast %118 : vector<8x1xi1> to vector<8x1xi1>
    %120 = vector.broadcast %119 : vector<8x1xi1> to vector<8x128xi1>
    %121 = arith.select %120, %115, %83 : vector<8x128xi1>, vector<8x128xf32>
    %c3_i32 = arith.constant 3 : i32
    %122 = arith.index_cast %c3_i32 : i32 to index
    %c0_26 = arith.constant 0 : index
    %c0_27 = arith.constant 0 : index
    %123 = vector.load %arg2[%122, %c0_26, %c0_27] : memref<8x8x384xf32, #tpu.memory_space<vmem>>, vector<1x8x384xf32>
    %124 = vector.shape_cast %123 : vector<1x8x384xf32> to vector<8x384xf32>
    %cst_28 = arith.constant dense<0.000000e+00> : vector<8x384xf32>
    %125 = tpu.matmul %121, %4, %cst_28 {dimension_numbers = #tpu.dot_dimension_numbers<[1], [0], [0], [1], [0, 0, 1, 1], [], []>} : vector<8x128xf32>, vector<128x384xf32>, vector<8x384xf32> -> vector<8x384xf32>
    %126 = vector.extract_strided_slice %124 {offsets = [0, 0], sizes = [8, 128], strides = [1, 1]} : vector<8x384xf32> to vector<8x128xf32>
    %127 = vector.extract_strided_slice %125 {offsets = [0, 0], sizes = [8, 128], strides = [1, 1]} : vector<8x384xf32> to vector<8x128xf32>
    %128 = arith.addf %126, %127 : vector<8x128xf32>
    %129 = arith.negf %128 : vector<8x128xf32>
    %130 = math.exp %129 : vector<8x128xf32>
    %cst_29 = arith.constant 1.000000e+00 : f32
    %131 = vector.broadcast %cst_29 : f32 to vector<8x128xf32>
    %132 = arith.addf %131, %130 : vector<8x128xf32>
    %133 = arith.divf %131, %132 : vector<8x128xf32>
    %134 = vector.extract_strided_slice %124 {offsets = [0, 128], sizes = [8, 128], strides = [1, 1]} : vector<8x384xf32> to vector<8x128xf32>
    %135 = vector.extract_strided_slice %125 {offsets = [0, 128], sizes = [8, 128], strides = [1, 1]} : vector<8x384xf32> to vector<8x128xf32>
    %136 = arith.addf %134, %135 : vector<8x128xf32>
    %137 = arith.negf %136 : vector<8x128xf32>
    %138 = math.exp %137 : vector<8x128xf32>
    %cst_30 = arith.constant 1.000000e+00 : f32
    %139 = vector.broadcast %cst_30 : f32 to vector<8x128xf32>
    %140 = arith.addf %139, %138 : vector<8x128xf32>
    %141 = arith.divf %139, %140 : vector<8x128xf32>
    %142 = vector.extract_strided_slice %124 {offsets = [0, 256], sizes = [8, 128], strides = [1, 1]} : vector<8x384xf32> to vector<8x128xf32>
    %143 = vector.extract_strided_slice %125 {offsets = [0, 256], sizes = [8, 128], strides = [1, 1]} : vector<8x384xf32> to vector<8x128xf32>
    %144 = vector.broadcast %5 : vector<1x128xf32> to vector<8x128xf32>
    %145 = arith.addf %143, %144 : vector<8x128xf32>
    %146 = arith.mulf %133, %145 : vector<8x128xf32>
    %147 = arith.addf %142, %146 : vector<8x128xf32>
    %148 = math.tanh %147 : vector<8x128xf32>
    %cst_31 = arith.constant 1.000000e+00 : f32
    %149 = vector.broadcast %cst_31 : f32 to vector<8x128xf32>
    %150 = arith.subf %149, %141 : vector<8x128xf32>
    %151 = arith.mulf %150, %148 : vector<8x128xf32>
    %152 = arith.mulf %141, %121 : vector<8x128xf32>
    %153 = arith.addf %151, %152 : vector<8x128xf32>
    %154 = arith.addi %6, %c3_i32 : i32
    %155 = vector.broadcast %154 : i32 to vector<8x1xi32>
    %156 = arith.cmpi slt, %155, %3 : vector<8x1xi32>
    %157 = vector.shape_cast %156 : vector<8x1xi1> to vector<8x1xi1>
    %158 = vector.broadcast %157 : vector<8x1xi1> to vector<8x128xi1>
    %159 = arith.select %158, %153, %121 : vector<8x128xi1>, vector<8x128xf32>
    %c4_i32 = arith.constant 4 : i32
    %160 = arith.index_cast %c4_i32 : i32 to index
    %c0_32 = arith.constant 0 : index
    %c0_33 = arith.constant 0 : index
    %161 = vector.load %arg2[%160, %c0_32, %c0_33] : memref<8x8x384xf32, #tpu.memory_space<vmem>>, vector<1x8x384xf32>
    %162 = vector.shape_cast %161 : vector<1x8x384xf32> to vector<8x384xf32>
    %cst_34 = arith.constant dense<0.000000e+00> : vector<8x384xf32>
    %163 = tpu.matmul %159, %4, %cst_34 {dimension_numbers = #tpu.dot_dimension_numbers<[1], [0], [0], [1], [0, 0, 1, 1], [], []>} : vector<8x128xf32>, vector<128x384xf32>, vector<8x384xf32> -> vector<8x384xf32>
    %164 = vector.extract_strided_slice %162 {offsets = [0, 0], sizes = [8, 128], strides = [1, 1]} : vector<8x384xf32> to vector<8x128xf32>
    %165 = vector.extract_strided_slice %163 {offsets = [0, 0], sizes = [8, 128], strides = [1, 1]} : vector<8x384xf32> to vector<8x128xf32>
    %166 = arith.addf %164, %165 : vector<8x128xf32>
    %167 = arith.negf %166 : vector<8x128xf32>
    %168 = math.exp %167 : vector<8x128xf32>
    %cst_35 = arith.constant 1.000000e+00 : f32
    %169 = vector.broadcast %cst_35 : f32 to vector<8x128xf32>
    %170 = arith.addf %169, %168 : vector<8x128xf32>
    %171 = arith.divf %169, %170 : vector<8x128xf32>
    %172 = vector.extract_strided_slice %162 {offsets = [0, 128], sizes = [8, 128], strides = [1, 1]} : vector<8x384xf32> to vector<8x128xf32>
    %173 = vector.extract_strided_slice %163 {offsets = [0, 128], sizes = [8, 128], strides = [1, 1]} : vector<8x384xf32> to vector<8x128xf32>
    %174 = arith.addf %172, %173 : vector<8x128xf32>
    %175 = arith.negf %174 : vector<8x128xf32>
    %176 = math.exp %175 : vector<8x128xf32>
    %cst_36 = arith.constant 1.000000e+00 : f32
    %177 = vector.broadcast %cst_36 : f32 to vector<8x128xf32>
    %178 = arith.addf %177, %176 : vector<8x128xf32>
    %179 = arith.divf %177, %178 : vector<8x128xf32>
    %180 = vector.extract_strided_slice %162 {offsets = [0, 256], sizes = [8, 128], strides = [1, 1]} : vector<8x384xf32> to vector<8x128xf32>
    %181 = vector.extract_strided_slice %163 {offsets = [0, 256], sizes = [8, 128], strides = [1, 1]} : vector<8x384xf32> to vector<8x128xf32>
    %182 = vector.broadcast %5 : vector<1x128xf32> to vector<8x128xf32>
    %183 = arith.addf %181, %182 : vector<8x128xf32>
    %184 = arith.mulf %171, %183 : vector<8x128xf32>
    %185 = arith.addf %180, %184 : vector<8x128xf32>
    %186 = math.tanh %185 : vector<8x128xf32>
    %cst_37 = arith.constant 1.000000e+00 : f32
    %187 = vector.broadcast %cst_37 : f32 to vector<8x128xf32>
    %188 = arith.subf %187, %179 : vector<8x128xf32>
    %189 = arith.mulf %188, %186 : vector<8x128xf32>
    %190 = arith.mulf %179, %159 : vector<8x128xf32>
    %191 = arith.addf %189, %190 : vector<8x128xf32>
    %192 = arith.addi %6, %c4_i32 : i32
    %193 = vector.broadcast %192 : i32 to vector<8x1xi32>
    %194 = arith.cmpi slt, %193, %3 : vector<8x1xi32>
    %195 = vector.shape_cast %194 : vector<8x1xi1> to vector<8x1xi1>
    %196 = vector.broadcast %195 : vector<8x1xi1> to vector<8x128xi1>
    %197 = arith.select %196, %191, %159 : vector<8x128xi1>, vector<8x128xf32>
    %c5_i32 = arith.constant 5 : i32
    %198 = arith.index_cast %c5_i32 : i32 to index
    %c0_38 = arith.constant 0 : index
    %c0_39 = arith.constant 0 : index
    %199 = vector.load %arg2[%198, %c0_38, %c0_39] : memref<8x8x384xf32, #tpu.memory_space<vmem>>, vector<1x8x384xf32>
    %200 = vector.shape_cast %199 : vector<1x8x384xf32> to vector<8x384xf32>
    %cst_40 = arith.constant dense<0.000000e+00> : vector<8x384xf32>
    %201 = tpu.matmul %197, %4, %cst_40 {dimension_numbers = #tpu.dot_dimension_numbers<[1], [0], [0], [1], [0, 0, 1, 1], [], []>} : vector<8x128xf32>, vector<128x384xf32>, vector<8x384xf32> -> vector<8x384xf32>
    %202 = vector.extract_strided_slice %200 {offsets = [0, 0], sizes = [8, 128], strides = [1, 1]} : vector<8x384xf32> to vector<8x128xf32>
    %203 = vector.extract_strided_slice %201 {offsets = [0, 0], sizes = [8, 128], strides = [1, 1]} : vector<8x384xf32> to vector<8x128xf32>
    %204 = arith.addf %202, %203 : vector<8x128xf32>
    %205 = arith.negf %204 : vector<8x128xf32>
    %206 = math.exp %205 : vector<8x128xf32>
    %cst_41 = arith.constant 1.000000e+00 : f32
    %207 = vector.broadcast %cst_41 : f32 to vector<8x128xf32>
    %208 = arith.addf %207, %206 : vector<8x128xf32>
    %209 = arith.divf %207, %208 : vector<8x128xf32>
    %210 = vector.extract_strided_slice %200 {offsets = [0, 128], sizes = [8, 128], strides = [1, 1]} : vector<8x384xf32> to vector<8x128xf32>
    %211 = vector.extract_strided_slice %201 {offsets = [0, 128], sizes = [8, 128], strides = [1, 1]} : vector<8x384xf32> to vector<8x128xf32>
    %212 = arith.addf %210, %211 : vector<8x128xf32>
    %213 = arith.negf %212 : vector<8x128xf32>
    %214 = math.exp %213 : vector<8x128xf32>
    %cst_42 = arith.constant 1.000000e+00 : f32
    %215 = vector.broadcast %cst_42 : f32 to vector<8x128xf32>
    %216 = arith.addf %215, %214 : vector<8x128xf32>
    %217 = arith.divf %215, %216 : vector<8x128xf32>
    %218 = vector.extract_strided_slice %200 {offsets = [0, 256], sizes = [8, 128], strides = [1, 1]} : vector<8x384xf32> to vector<8x128xf32>
    %219 = vector.extract_strided_slice %201 {offsets = [0, 256], sizes = [8, 128], strides = [1, 1]} : vector<8x384xf32> to vector<8x128xf32>
    %220 = vector.broadcast %5 : vector<1x128xf32> to vector<8x128xf32>
    %221 = arith.addf %219, %220 : vector<8x128xf32>
    %222 = arith.mulf %209, %221 : vector<8x128xf32>
    %223 = arith.addf %218, %222 : vector<8x128xf32>
    %224 = math.tanh %223 : vector<8x128xf32>
    %cst_43 = arith.constant 1.000000e+00 : f32
    %225 = vector.broadcast %cst_43 : f32 to vector<8x128xf32>
    %226 = arith.subf %225, %217 : vector<8x128xf32>
    %227 = arith.mulf %226, %224 : vector<8x128xf32>
    %228 = arith.mulf %217, %197 : vector<8x128xf32>
    %229 = arith.addf %227, %228 : vector<8x128xf32>
    %230 = arith.addi %6, %c5_i32 : i32
    %231 = vector.broadcast %230 : i32 to vector<8x1xi32>
    %232 = arith.cmpi slt, %231, %3 : vector<8x1xi32>
    %233 = vector.shape_cast %232 : vector<8x1xi1> to vector<8x1xi1>
    %234 = vector.broadcast %233 : vector<8x1xi1> to vector<8x128xi1>
    %235 = arith.select %234, %229, %197 : vector<8x128xi1>, vector<8x128xf32>
    %c6_i32 = arith.constant 6 : i32
    %236 = arith.index_cast %c6_i32 : i32 to index
    %c0_44 = arith.constant 0 : index
    %c0_45 = arith.constant 0 : index
    %237 = vector.load %arg2[%236, %c0_44, %c0_45] : memref<8x8x384xf32, #tpu.memory_space<vmem>>, vector<1x8x384xf32>
    %238 = vector.shape_cast %237 : vector<1x8x384xf32> to vector<8x384xf32>
    %cst_46 = arith.constant dense<0.000000e+00> : vector<8x384xf32>
    %239 = tpu.matmul %235, %4, %cst_46 {dimension_numbers = #tpu.dot_dimension_numbers<[1], [0], [0], [1], [0, 0, 1, 1], [], []>} : vector<8x128xf32>, vector<128x384xf32>, vector<8x384xf32> -> vector<8x384xf32>
    %240 = vector.extract_strided_slice %238 {offsets = [0, 0], sizes = [8, 128], strides = [1, 1]} : vector<8x384xf32> to vector<8x128xf32>
    %241 = vector.extract_strided_slice %239 {offsets = [0, 0], sizes = [8, 128], strides = [1, 1]} : vector<8x384xf32> to vector<8x128xf32>
    %242 = arith.addf %240, %241 : vector<8x128xf32>
    %243 = arith.negf %242 : vector<8x128xf32>
    %244 = math.exp %243 : vector<8x128xf32>
    %cst_47 = arith.constant 1.000000e+00 : f32
    %245 = vector.broadcast %cst_47 : f32 to vector<8x128xf32>
    %246 = arith.addf %245, %244 : vector<8x128xf32>
    %247 = arith.divf %245, %246 : vector<8x128xf32>
    %248 = vector.extract_strided_slice %238 {offsets = [0, 128], sizes = [8, 128], strides = [1, 1]} : vector<8x384xf32> to vector<8x128xf32>
    %249 = vector.extract_strided_slice %239 {offsets = [0, 128], sizes = [8, 128], strides = [1, 1]} : vector<8x384xf32> to vector<8x128xf32>
    %250 = arith.addf %248, %249 : vector<8x128xf32>
    %251 = arith.negf %250 : vector<8x128xf32>
    %252 = math.exp %251 : vector<8x128xf32>
    %cst_48 = arith.constant 1.000000e+00 : f32
    %253 = vector.broadcast %cst_48 : f32 to vector<8x128xf32>
    %254 = arith.addf %253, %252 : vector<8x128xf32>
    %255 = arith.divf %253, %254 : vector<8x128xf32>
    %256 = vector.extract_strided_slice %238 {offsets = [0, 256], sizes = [8, 128], strides = [1, 1]} : vector<8x384xf32> to vector<8x128xf32>
    %257 = vector.extract_strided_slice %239 {offsets = [0, 256], sizes = [8, 128], strides = [1, 1]} : vector<8x384xf32> to vector<8x128xf32>
    %258 = vector.broadcast %5 : vector<1x128xf32> to vector<8x128xf32>
    %259 = arith.addf %257, %258 : vector<8x128xf32>
    %260 = arith.mulf %247, %259 : vector<8x128xf32>
    %261 = arith.addf %256, %260 : vector<8x128xf32>
    %262 = math.tanh %261 : vector<8x128xf32>
    %cst_49 = arith.constant 1.000000e+00 : f32
    %263 = vector.broadcast %cst_49 : f32 to vector<8x128xf32>
    %264 = arith.subf %263, %255 : vector<8x128xf32>
    %265 = arith.mulf %264, %262 : vector<8x128xf32>
    %266 = arith.mulf %255, %235 : vector<8x128xf32>
    %267 = arith.addf %265, %266 : vector<8x128xf32>
    %268 = arith.addi %6, %c6_i32 : i32
    %269 = vector.broadcast %268 : i32 to vector<8x1xi32>
    %270 = arith.cmpi slt, %269, %3 : vector<8x1xi32>
    %271 = vector.shape_cast %270 : vector<8x1xi1> to vector<8x1xi1>
    %272 = vector.broadcast %271 : vector<8x1xi1> to vector<8x128xi1>
    %273 = arith.select %272, %267, %235 : vector<8x128xi1>, vector<8x128xf32>
    %c7_i32 = arith.constant 7 : i32
    %274 = arith.index_cast %c7_i32 : i32 to index
    %c0_50 = arith.constant 0 : index
    %c0_51 = arith.constant 0 : index
    %275 = vector.load %arg2[%274, %c0_50, %c0_51] : memref<8x8x384xf32, #tpu.memory_space<vmem>>, vector<1x8x384xf32>
    %276 = vector.shape_cast %275 : vector<1x8x384xf32> to vector<8x384xf32>
    %cst_52 = arith.constant dense<0.000000e+00> : vector<8x384xf32>
    %277 = tpu.matmul %273, %4, %cst_52 {dimension_numbers = #tpu.dot_dimension_numbers<[1], [0], [0], [1], [0, 0, 1, 1], [], []>} : vector<8x128xf32>, vector<128x384xf32>, vector<8x384xf32> -> vector<8x384xf32>
    %278 = vector.extract_strided_slice %276 {offsets = [0, 0], sizes = [8, 128], strides = [1, 1]} : vector<8x384xf32> to vector<8x128xf32>
    %279 = vector.extract_strided_slice %277 {offsets = [0, 0], sizes = [8, 128], strides = [1, 1]} : vector<8x384xf32> to vector<8x128xf32>
    %280 = arith.addf %278, %279 : vector<8x128xf32>
    %281 = arith.negf %280 : vector<8x128xf32>
    %282 = math.exp %281 : vector<8x128xf32>
    %cst_53 = arith.constant 1.000000e+00 : f32
    %283 = vector.broadcast %cst_53 : f32 to vector<8x128xf32>
    %284 = arith.addf %283, %282 : vector<8x128xf32>
    %285 = arith.divf %283, %284 : vector<8x128xf32>
    %286 = vector.extract_strided_slice %276 {offsets = [0, 128], sizes = [8, 128], strides = [1, 1]} : vector<8x384xf32> to vector<8x128xf32>
    %287 = vector.extract_strided_slice %277 {offsets = [0, 128], sizes = [8, 128], strides = [1, 1]} : vector<8x384xf32> to vector<8x128xf32>
    %288 = arith.addf %286, %287 : vector<8x128xf32>
    %289 = arith.negf %288 : vector<8x128xf32>
    %290 = math.exp %289 : vector<8x128xf32>
    %cst_54 = arith.constant 1.000000e+00 : f32
    %291 = vector.broadcast %cst_54 : f32 to vector<8x128xf32>
    %292 = arith.addf %291, %290 : vector<8x128xf32>
    %293 = arith.divf %291, %292 : vector<8x128xf32>
    %294 = vector.extract_strided_slice %276 {offsets = [0, 256], sizes = [8, 128], strides = [1, 1]} : vector<8x384xf32> to vector<8x128xf32>
    %295 = vector.extract_strided_slice %277 {offsets = [0, 256], sizes = [8, 128], strides = [1, 1]} : vector<8x384xf32> to vector<8x128xf32>
    %296 = vector.broadcast %5 : vector<1x128xf32> to vector<8x128xf32>
    %297 = arith.addf %295, %296 : vector<8x128xf32>
    %298 = arith.mulf %285, %297 : vector<8x128xf32>
    %299 = arith.addf %294, %298 : vector<8x128xf32>
    %300 = math.tanh %299 : vector<8x128xf32>
    %cst_55 = arith.constant 1.000000e+00 : f32
    %301 = vector.broadcast %cst_55 : f32 to vector<8x128xf32>
    %302 = arith.subf %301, %293 : vector<8x128xf32>
    %303 = arith.mulf %302, %300 : vector<8x128xf32>
    %304 = arith.mulf %293, %273 : vector<8x128xf32>
    %305 = arith.addf %303, %304 : vector<8x128xf32>
    %306 = arith.addi %6, %c7_i32 : i32
    %307 = vector.broadcast %306 : i32 to vector<8x1xi32>
    %308 = arith.cmpi slt, %307, %3 : vector<8x1xi32>
    %309 = vector.shape_cast %308 : vector<8x1xi1> to vector<8x1xi1>
    %310 = vector.broadcast %309 : vector<8x1xi1> to vector<8x128xi1>
    %311 = arith.select %310, %305, %273 : vector<8x128xi1>, vector<8x128xf32>
    %c8_i32_56 = arith.constant 8 : i32
    %c0_57 = arith.constant 0 : index
    %c0_58 = arith.constant 0 : index
    %312 = vector.load %arg11[%c0_57, %c0_58] : memref<8x128xf32, #tpu.memory_space<vmem>>, vector<8x128xf32>
    tpu.vector_store %arg11[%c0_57, %c0_58], %311 {strides = array<i32>} : memref<8x128xf32, #tpu.memory_space<vmem>>, vector<8x128xf32>,
    %c0_i32_59 = arith.constant 0 : i32
    %313 = arith.cmpi eq, %arg1, %c0_i32_59 : i32
    %314 = arith.extui %313 : i1 to i32
    %c0_i32_60 = arith.constant 0 : i32
    %315 = arith.cmpi ne, %314, %c0_i32_60 : i32
    scf.if %315 {
      %c0_61 = arith.constant 0 : index
      %c0_62 = arith.constant 0 : index
      %316 = vector.load %arg7[%c0_61, %c0_62] : memref<128x128xf32, #tpu.memory_space<vmem>>, vector<128x128xf32>
      %cst_63 = arith.constant dense<0.000000e+00> : vector<8x128xf32>
      %317 = tpu.matmul %311, %316, %cst_63 {dimension_numbers = #tpu.dot_dimension_numbers<[1], [0], [0], [1], [0, 0, 1, 1], [], []>} : vector<8x128xf32>, vector<128x128xf32>, vector<8x128xf32> -> vector<8x128xf32>
      %c0_64 = arith.constant 0 : index
      %c0_65 = arith.constant 0 : index
      %318 = vector.load %arg8[%c0_64, %c0_65] : memref<1x128xf32, #tpu.memory_space<vmem>>, vector<1x128xf32>
      %319 = vector.broadcast %318 : vector<1x128xf32> to vector<8x128xf32>
      %320 = arith.addf %317, %319 : vector<8x128xf32>
      %cst_66 = arith.constant dense<0xFF800000> : vector<8xf32>
      %321 = vector.multi_reduction <maximumf>, %320, %cst_66 [1] : vector<8x128xf32> to vector<8xf32>
      %322 = vector.shape_cast %321 : vector<8xf32> to vector<8x1xf32>
      %323 = vector.broadcast %322 : vector<8x1xf32> to vector<8x128xf32>
      %324 = arith.subf %320, %323 : vector<8x128xf32>
      %325 = math.exp %324 : vector<8x128xf32>
      %cst_67 = arith.constant dense<0.000000e+00> : vector<8xf32>
      %326 = vector.multi_reduction <add>, %325, %cst_67 [1] : vector<8x128xf32> to vector<8xf32>
      %327 = vector.shape_cast %326 : vector<8xf32> to vector<8x1xf32>
      %328 = math.log %327 : vector<8x1xf32>
      %329 = arith.addf %328, %322 : vector<8x1xf32>
      %330 = vector.broadcast %329 : vector<8x1xf32> to vector<8x128xf32>
      %331 = arith.subf %320, %330 : vector<8x128xf32>
      %c0_68 = arith.constant 0 : index
      %c0_69 = arith.constant 0 : index
      %332 = vector.load %arg9[%c0_68, %c0_69] : memref<8x128xf32, #tpu.memory_space<vmem>>, vector<8x128xf32>
      tpu.vector_store %arg9[%c0_68, %c0_69], %331 {strides = array<i32>} : memref<8x128xf32, #tpu.memory_space<vmem>>, vector<8x128xf32>,
      %c0_70 = arith.constant 0 : index
      %c0_71 = arith.constant 0 : index
      %333 = vector.load %arg10[%c0_70, %c0_71] : memref<8x128xf32, #tpu.memory_space<vmem>>, vector<8x128xf32>
      tpu.vector_store %arg10[%c0_70, %c0_71], %311 {strides = array<i32>} : memref<8x128xf32, #tpu.memory_space<vmem>>, vector<8x128xf32>,
    } else {
    }
    return
  }
  func.func @transform_0(%arg0: i32, %arg1: i32) -> (i32, i32, i32) {
    %c0_i32 = arith.constant 0 : i32
    %c0_i32_0 = arith.constant 0 : i32
    return %arg1, %arg0, %c0_i32 : i32, i32, i32
  }
  func.func @transform_1(%arg0: i32, %arg1: i32) -> (i32, i32) {
    %c0_i32 = arith.constant 0 : i32
    %c0_i32_0 = arith.constant 0 : i32
    return %arg0, %c0_i32 : i32, i32
  }
  func.func @transform_2(%arg0: i32, %arg1: i32) -> (i32, i32) {
    %c0_i32 = arith.constant 0 : i32
    %c0_i32_0 = arith.constant 0 : i32
    return %arg0, %c0_i32 : i32, i32
  }
  func.func @transform_3(%arg0: i32, %arg1: i32) -> (i32, i32) {
    %c0_i32 = arith.constant 0 : i32
    %c0_i32_0 = arith.constant 0 : i32
    %c0_i32_1 = arith.constant 0 : i32
    return %c0_i32, %c0_i32_0 : i32, i32
  }
  func.func @transform_4(%arg0: i32, %arg1: i32) -> (i32, i32) {
    %c0_i32 = arith.constant 0 : i32
    %c0_i32_0 = arith.constant 0 : i32
    %c0_i32_1 = arith.constant 0 : i32
    return %c0_i32, %c0_i32_0 : i32, i32
  }
  func.func @transform_5(%arg0: i32, %arg1: i32) -> (i32, i32) {
    %c0_i32 = arith.constant 0 : i32
    %c0_i32_0 = arith.constant 0 : i32
    %c0_i32_1 = arith.constant 0 : i32
    return %c0_i32, %c0_i32_0 : i32, i32
  }
  func.func @transform_6(%arg0: i32, %arg1: i32) -> (i32, i32) {
    %c0_i32 = arith.constant 0 : i32
    %c0_i32_0 = arith.constant 0 : i32
    %c0_i32_1 = arith.constant 0 : i32
    return %c0_i32, %c0_i32_0 : i32, i32
  }
  func.func @transform_7(%arg0: i32, %arg1: i32) -> (i32, i32) {
    %c0_i32 = arith.constant 0 : i32
    %c0_i32_0 = arith.constant 0 : i32
    return %arg0, %c0_i32 : i32, i32
  }
  func.func @transform_8(%arg0: i32, %arg1: i32) -> (i32, i32) {
    %c0_i32 = arith.constant 0 : i32
    %c0_i32_0 = arith.constant 0 : i32
    return %arg0, %c0_i32 : i32, i32
  }
}

</mosaic_0001>

<bundles_post_ra>
// kernel: tpu_custom_call.1
= control target key start
LH: loop header
LB: loop body
LE: loop exit
PB: predicated region body
PF: predicated region fallthrough
CT: control target
= control target key end

     0   :  { %14 = vsyncpa [#allocation4], 0  ;;  %s3343_s0 = inlined_call_operand.hbm [shape: f32[8,8,384], index: 0, kind: input, shape index: {}]   ;;  %s3344_s1 = inlined_call_operand.vmem [shape: f32[8,128], index: 1, kind: input, shape index: {}]   ;;  %s3345_s2 = inlined_call_operand.vmem [shape: s32[8,1], index: 2, kind: input, shape index: {}]   ;;  %s3346_s3 = inlined_call_operand.hbm [shape: f32[128,384], index: 3, kind: input, shape index: {}]   ;;  %s3347_s4 = inlined_call_operand.vmem [shape: f32[1,128], index: 4, kind: input, shape index: {}]   ;;  %s3348_s5 = inlined_call_operand.hbm [shape: f32[128,128], index: 5, kind: input, shape index: {}]   ;;  %s3349_s6 = inlined_call_operand.vmem [shape: f32[1,128], index: 6, kind: input, shape index: {}]   ;;  %s3350_s7 = inlined_call_operand.hbm [shape: f32[8,128], index: 7, kind: output, shape index: {0}]   ;;  %s3351_s8 = inlined_call_operand.hbm [shape: f32[8,128], index: 8, kind: output, shape index: {1}]  }
   0x1   :  { %15 = vsyncpa [#allocation7], 0 }
   0x2   :  { %16 = vsyncpa [#allocation5], 0 }
   0x3   :  { %17 = vsyncpa [#allocation11], 0  ;;  %s2430_s27 = smov [#allocation6]   ;;  %s2431_s29 = smov [#allocation3]  }
   0x4   :  { %s39_s28 = sshll.u32 %s2430_s27, 4  ;;  %s23_s30 = sshll.u32 %s2431_s29, 4  ;;  %s40_s28 = int_to_ptr.vmem [resolvable:$true] %s39_s28  ;;  %s24_s30 = int_to_ptr.vmem [resolvable:$true] %s23_s30 }
   0x5   :  { %s2330_s9 = scalar_lea.vmem %s40_s28, 6144  ;;  %p2335_p1 = scmp.lt.s32.totalorder %s40_s28, %s40_s28 }
   0x6   :  { %p2331_p0 = scmp.ne.s32.totalorder %s40_s28, %s2330_s9  ;;  %p2336_p2 = scmp.lt.s32.totalorder %s2330_s9, %s2330_s9 }
   0x8   :  { %p2337_p3 = por %p2336_p2, %p2335_p1 }
   0xa   :  { %p2338_p4 = pnand %p2337_p3, %p2331_p0 }
   0xc   :  { %2341 = shalt.err (!%p2338_p4)
}
   0xd   :  { %s2432_s10 = smov 384   ;;  %s2433_s11 = smov 24  }
   0xe   :  { %45 = dma.hbm_to_vmem [thread:$0]  %s3346_s3, 6144, %s40_s28, [#allocation7], %s2432_s10, %s2432_s10, %s2433_s11  }
   0xf   :  { %s2350_s14 = scalar_lea.vmem %s24_s30, 3072  ;;  %p2355_p6 = scmp.lt.s32.totalorder %s24_s30, %s24_s30 }
  0x10   :  { %p2351_p5 = scmp.ne.s32.totalorder %s24_s30, %s2350_s14  ;;  %p2356_p7 = scmp.lt.s32.totalorder %s2350_s14, %s2350_s14 }
  0x12   :  { %p2357_p8 = por %p2356_p7, %p2355_p6 }
  0x14   :  { %p2358_p9 = pnand %p2357_p8, %p2351_p5 }
  0x16   :  { %2361 = shalt.err (!%p2358_p9)
}
  0x17   :  { %29 = dma.hbm_to_vmem [thread:$0]  %s3343_s0, 3072, %s24_s30, [#allocation4], %s2432_s10, %s2432_s10, %s2433_s11  }
  0x18   :  { %s2434_s17 = smov [#allocation8]  }
  0x19   :  { %s53_s18 = sshll.u32 %s2434_s17, 4  ;;  %s54_s18 = int_to_ptr.vmem [resolvable:$true] %s53_s18 }
  0x1a   :  { %s2370_s19 = scalar_lea.vmem %s54_s18, 2048  ;;  %p2375_p11 = scmp.lt.s32.totalorder %s54_s18, %s54_s18 }
  0x1b   :  { %p2371_p10 = scmp.ne.s32.totalorder %s54_s18, %s2370_s19  ;;  %p2376_p12 = scmp.lt.s32.totalorder %s2370_s19, %s2370_s19 }
  0x1d   :  { %p2377_p13 = por %p2376_p12, %p2375_p11 }
  0x1f   :  { %p2378_p0 = pnand %p2377_p13, %p2371_p10 }
  0x21   :  { %2381 = shalt.err (!%p2378_p0)
}
  0x22   :  { %s2435_s3 = smov 128   ;;  %s2436_s20 = smov 8  }
  0x23   :  { %59 = dma.hbm_to_vmem [thread:$0]  %s3348_s5, 2048, %s54_s18, [#allocation7], %s2435_s3, %s2435_s3, %s2436_s20  }
  0x24   :  { %2422 = dma.done.wait [#allocation4], 3072  }
  0x25   :  { %2423 = vsyncadd [#allocation4], 4294964224 }
  0x26   :  { %2424 = dma.done.wait [#allocation7], 8192  }
  0x27   :  { %2425 = vsyncadd [#allocation7], 4294959104  ;;  %v3354_v0 = vmov 0.0   ;;  %vm2438_vm0 = vmmov 0   ;;  %v3352_v1 = vmov 0   ;;  %v2502_v2 = vld [vmem:[#allocation6 + $0x170] sm:$0xff] }
  0x28   :  { %1860 = vmatprep.subr.mxu1 %v3354_v0  ;;  %196 = vmatprep.mubr.f32.mxu0 %v3354_v0  ;;  %3369 = vst [vmem:[#allocation16_spill] sm:$0xff] %v2502_v2  ;;  %v2504_v3 = vld [vmem:[#allocation6 + $0x168] sm:$0xff]  ;;  %v2506_v4 = vld [vmem:[#allocation6 + $0x158] sm:$0xff]  ;;  %v2509_v5 = vld [vmem:[#allocation6 + $0x150] sm:$0xff]  ;;  %s2440_s28 = smov [#allocation10]  }
  0x29   :  { %1892 = vmatprep.mubr.msk.f32.mxu1 %vm2438_vm0, %v3354_v0  ;;  %2187 = vset.pattern.permute.xlu0 %v3352_v1  ;;  %v2512_v6 = vld [vmem:[#allocation6 + $0x140] sm:$0xff]  ;;  %v2515_v7 = vld [vmem:[#allocation6 + $0x138] sm:$0xff]  ;;  %v2518_v8 = vld [vmem:[#allocation6 + $0x128] sm:$0xff]  ;;  %s1667_s29 = sshll.u32 %s2440_s28, 4  ;;  %s1668_s29 = int_to_ptr.vmem [resolvable:$true] %s1667_s29 }
  0x2a   :  { %2188 = vset.pattern.permute.xlu1 %v3352_v1  ;;  %132 = vmatprep.subr.mxu0 %v2502_v2  ;;  %v2521_v9 = vld [vmem:[#allocation6 + $0x120] sm:$0xff]  ;;  %v2524_v10 = vld [vmem:[#allocation6 + $0x110] sm:$0xff]  ;;  %v2527_v11 = vld [vmem:[#allocation6 + $0x108] sm:$0xff]  ;;  %s2382_s30 = scalar_lea.vmem %s1668_s29, 128  ;;  %p2387_p2 = scmp.lt.s32.totalorder %s1668_s29, %s1668_s29 }
  0x2b   :  { %133 = vmatpush1.msra.mxu0 %v2504_v3  ;;  %v2530_v12 = vld [vmem:[#allocation6 + $0xf8] sm:$0xff]  ;;  %v2533_v13 = vld [vmem:[#allocation6 + $0xf0] sm:$0xff]  ;;  %v2536_v14 = vld [vmem:[#allocation6 + $0xe0] sm:$0xff]  ;;  %p2383_p1 = scmp.ne.s32.totalorder %s1668_s29, %s2382_s30  ;;  %p2388_p3 = scmp.lt.s32.totalorder %s2382_s30, %s2382_s30 }
  0x2c   :  { %134 = vmatprep.subr.mxu0 %v2506_v4  ;;  %v2538_v15 = vld [vmem:[#allocation6 + $0x178] sm:$0xff]  ;;  %v2544_v17 = vld [vmem:[#allocation6 + $0x160] sm:$0xff]  ;;  %v2547_v18 = vld [vmem:[#allocation6 + $0xc8] sm:$0xff] }
  0x2d   :  { %135 = vmatpush1.msra.mxu0 %v2509_v5  ;;  %v2541_v16 = vld [vmem:[#allocation6 + $0xd8] sm:$0xff]  ;;  %1861 = vmatpush3.msra.mxu1 %v2538_v15  ;;  %v2550_v19 = vld [vmem:[#allocation6 + $0x148] sm:$0xff]  ;;  %v2553_v20 = vld [vmem:[#allocation6 + $0xc0] sm:$0xff]  ;;  %p2389_p4 = por %p2388_p3, %p2387_p2 }
  0x2e   :  { %136 = vmatprep.subr.mxu0 %v2512_v6  ;;  %1862 = vmatprep.subr.mxu1 %v3354_v0  ;;  %v2557_v21 = vld [vmem:[#allocation6 + $0xb0] sm:$0xff]  ;;  %v2563_v23 = vld [vmem:[#allocation6 + $0xa8] sm:$0xff]  ;;  %v2567_v24 = vld [vmem:[#allocation6 + $0x98] sm:$0xff] }
  0x2f   :  { %137 = vmatpush1.msra.mxu0 %v2515_v7  ;;  %1863 = vmatpush3.msra.mxu1 %v2544_v17  ;;  %v2560_v22 = vld [vmem:[#allocation6 + $0x130] sm:$0xff]  ;;  %v2570_v25 = vld [vmem:[#allocation6 + $0x118] sm:$0xff]  ;;  %v2577_v27 = vld [vmem:[#allocation6 + $0x80] sm:$0xff]  ;;  %p2390_p5 = pnand %p2389_p4, %p2383_p1 }
  0x30   :  { %138 = vmatprep.subr.mxu0 %v2518_v8  ;;  %1864 = vmatprep.subr.mxu1 %v3354_v0  ;;  %v2573_v26 = vld [vmem:[#allocation6 + $0x90] sm:$0xff]  ;;  %v2580_v28 = vld [vmem:[#allocation6 + $0x100] sm:$0xff]  ;;  %v2583_v29 = vld [vmem:[#allocation6 + $0x78] sm:$0xff] }
  0x31   :  { %139 = vmatpush1.msra.mxu0 %v2521_v9  ;;  %1865 = vmatpush3.msra.mxu1 %v2550_v19  ;;  %v2587_v30 = vld [vmem:[#allocation6 + $0x68] sm:$0xff]  ;;  %v2593_v32 = vld [vmem:[#allocation6 + $0x60] sm:$0xff]  ;;  %v2597_v33 = vld [vmem:[#allocation6 + $0x50] sm:$0xff] }
  0x32   :  { %140 = vmatprep.subr.mxu0 %v2524_v10  ;;  %1866 = vmatprep.subr.mxu1 %v3354_v0  ;;  %v2590_v31 = vld [vmem:[#allocation6 + $0xe8] sm:$0xff]  ;;  %v2600_v34 = vld [vmem:[#allocation6 + $0xd0] sm:$0xff]  ;;  %v2607_v36 = vld [vmem:[#allocation6 + $0x38] sm:$0xff] }
  0x33   :  { %141 = vmatpush1.msra.mxu0 %v2527_v11  ;;  %1867 = vmatpush3.msra.mxu1 %v2560_v22  ;;  %v2603_v35 = vld [vmem:[#allocation6 + $0x48] sm:$0xff]  ;;  %v2610_v37 = vld [vmem:[#allocation6 + $0xb8] sm:$0xff]  ;;  %v2613_v38 = vld [vmem:[#allocation6 + $0x30] sm:$0xff] }
  0x34   :  { %142 = vmatprep.subr.mxu0 %v2530_v12  ;;  %1868 = vmatprep.subr.mxu1 %v3354_v0  ;;  %v2619_v39 = vld [vmem:[%s3345_s2] sm:$0xff]  ;;  %v2628_v42 = vld [vmem:[#allocation6 + $0x18] sm:$0xff]  ;;  %v2632_v43 = vld [vmem:[#allocation6 + $0x8] sm:$0xff] }
  0x35   :  { %143 = vmatpush1.msra.mxu0 %v2533_v13  ;;  %1869 = vmatpush3.msra.mxu1 %v2570_v25  ;;  %3370 = vst [vmem:[#allocation17_spill] sm:$0xff] %v2619_v39  ;;  %v2622_v40 = vld [vmem:[#allocation6 + $0x20] sm:$0xff]  ;;  %3371 = vst [vmem:[#allocation18_spill] sm:$0xff] %v2632_v43  ;;  %v2635_v44 = vld [vmem:[#allocation6 + $0x88] sm:$0xff]  ;;  %vm1684_vm1 = vcmp.gt.s32.totalorder %v2619_v39, 0  ;;  %vm1687_vm2 = vcmp.gt.s32.totalorder %v2619_v39, 1 }
  0x36   :  { %144 = vmatprep.subr.mxu0 %v2536_v14  ;;  %1870 = vmatprep.subr.mxu1 %v3354_v0  ;;  %v2625_v41 = vld [vmem:[#allocation6 + $0xa0] sm:$0xff]  ;;  %v2649_v47 = vld [vmem:[#allocation6 + $0x70] sm:$0xff]  ;;  %v303_v48 = vsel %vm1684_vm1, 1, %v3352_v1  ;;  %v2656_v49 = vld [vmem:[#allocation6 + $0x58] sm:$0xff]  ;;  %v479_v51 = vsel %vm1687_vm2, 1, %v3352_v1  ;;  %vm1696_vm3 = vcmp.gt.s32.totalorder %v2619_v39, 4 }
  0x37   :  { %145 = vmatpush1.msra.mxu0 %v2541_v16  ;;  %1871 = vmatpush3.msra.mxu1 %v2580_v28  ;;  %v2639_v45 = vld [vmem:[#allocation6] sm:$0xff]  ;;  %v2668_v52 = vld [vmem:[#allocation6 + $0x28] sm:$0xff]  ;;  %v2675_v53 = vld [vmem:[#allocation6 + $0x10] sm:$0xff]  ;;  %v1007_v54 = vsel %vm1696_vm3, 1, %v3352_v1  ;;  %vm1702_vm4 = vcmp.gt.s32.totalorder %v2619_v39, 6 }
  0x38   :  { %146 = vmatprep.subr.mxu0 %v2547_v18  ;;  %1872 = vmatprep.subr.mxu1 %v3354_v0  ;;  %3372 = vst [vmem:[#allocation19_spill] sm:$0xff] %v2639_v45  ;;  %v2646_v46 = vld [vmem:[%s3344_s1] sm:$0xff]  ;;  %3373 = vst [vmem:[#allocation20_spill] sm:$0xff] %v2668_v52  ;;  %v1359_v55 = vsel %vm1702_vm4, 1, %v3352_v1  ;;  %v130_v60 = vld [vmem:[#allocation3 + $0x8] sm:$0xff] }
  0x39   :  { %147 = vmatpush1.msra.mxu0 %v2553_v20  ;;  %1873 = vmatpush3.msra.mxu1 %v2590_v31  ;;  %v2662_v50 = vld [vmem:[#allocation6 + $0x40] sm:$0xff]  ;;  %3374 = vst [vmem:[#allocation21_spill] sm:$0xff] %v2675_v53 }
  0x3a   :  { %148 = vmatprep.subr.mxu0 %v2557_v21  ;;  %1874 = vmatprep.subr.mxu1 %v3354_v0  ;;  %v129_v56 = vld [vmem:[#allocation3] sm:$0xff] }
  0x3b   :  { %149 = vmatpush1.msra.mxu0 %v2563_v23  ;;  %1875 = vmatpush3.msra.mxu1 %v2600_v34 }
  0x3c   :  { %150 = vmatprep.subr.mxu0 %v2567_v24  ;;  %1876 = vmatprep.subr.mxu1 %v3354_v0 }
  0x3d   :  { %151 = vmatpush1.msra.mxu0 %v2573_v26  ;;  %1877 = vmatpush3.msra.mxu1 %v2610_v37 }
  0x3e   :  { %152 = vmatprep.subr.mxu0 %v2577_v27  ;;  %1878 = vmatprep.subr.mxu1 %v3354_v0 }
  0x3f   :  { %153 = vmatpush1.msra.mxu0 %v2583_v29  ;;  %1879 = vmatpush3.msra.mxu1 %v2625_v41 }
  0x40   :  { %154 = vmatprep.subr.mxu0 %v2587_v30  ;;  %1880 = vmatprep.subr.mxu1 %v3354_v0 }
  0x41   :  { %155 = vmatpush1.msra.mxu0 %v2593_v32  ;;  %1881 = vmatpush3.msra.mxu1 %v2635_v44 }
  0x42   :  { %156 = vmatprep.subr.mxu0 %v2597_v33  ;;  %1882 = vmatprep.subr.mxu1 %v3354_v0 }
  0x43   :  { %157 = vmatpush1.msra.mxu0 %v2603_v35  ;;  %1883 = vmatpush3.msra.mxu1 %v2649_v47 }
  0x44   :  { %158 = vmatprep.subr.mxu0 %v2607_v36  ;;  %1884 = vmatprep.subr.mxu1 %v3354_v0 }
  0x45   :  { %159 = vmatpush1.msra.mxu0 %v2613_v38  ;;  %305 = vperm.xlu0 %2187, %v303_v48  }
  0x46   :  { %160 = vmatprep.subr.mxu0 %v2622_v40  ;;  %1885 = vmatpush3.msra.mxu1 %v2656_v49 }
  0x47   :  { %161 = vmatpush1.msra.mxu0 %v2628_v42  ;;  %1886 = vmatprep.subr.mxu1 %v3354_v0 }
  0x48   :  { %162 = vmatprep.subr.mxu0 %v2632_v43  ;;  %1887 = vmatpush3.msra.mxu1 %v2662_v50 }
  0x49   :  { %163 = vmatpush1.msra.mxu0 %v2639_v45  ;;  %1888 = vmatprep.subr.mxu1 %v3354_v0 }
  0x4a   :  { %197 = vmatmul.mubr.f32.vlgmr.msra.gmra.mxu0 %v2646_v46  ;;  %313 = vmatprep.subr.mxu0 %v2502_v2 }
  0x4b   :  { %314 = vmatpush1.msra.mxu0 %v2504_v3  ;;  %481 = vperm.xlu0 %2187, %v479_v51  }
  0x4c   :  { %315 = vmatprep.subr.mxu0 %v2506_v4  ;;  %1889 = vmatpush3.msra.mxu1 %v2668_v52 }
  0x4d   :  { %316 = vmatpush1.msra.mxu0 %v2509_v5  ;;  %1890 = vmatprep.subr.mxu1 %v3354_v0 }
  0x4e   :  { %317 = vmatprep.subr.mxu0 %v2512_v6  ;;  %1891 = vmatpush3.msra.mxu1 %v2675_v53 }
  0x4f   :  { %318 = vmatpush1.msra.mxu0 %v2515_v7  ;;  %1893 = vmatmul.mubr.f32.vlgmr.msra.gmra.mxu1 %v2646_v46 }
  0x50   :  { %1009 = vperm.xlu0 %2187, %v1007_v54   ;;  %1895 = vmatprep.subr.mxu1 %v3354_v0 }
  0x51   :  { %319 = vmatprep.subr.mxu0 %v2518_v8  ;;  %1896 = vmatpush3.msra.mxu1 %v2538_v15 }
  0x52   :  { %320 = vmatpush1.msra.mxu0 %v2521_v9  ;;  %1897 = vmatprep.subr.mxu1 %v3354_v0 }
  0x53   :  { %321 = vmatprep.subr.mxu0 %v2524_v10  ;;  %1898 = vmatpush3.msra.mxu1 %v2544_v17 }
  0x54   :  { %1361 = vperm.xlu0 %2187, %v1359_v55   ;;  %1899 = vmatprep.subr.mxu1 %v3354_v0 }
  0x55   :  { %322 = vmatpush1.msra.mxu0 %v2527_v11  ;;  %1900 = vmatpush3.msra.mxu1 %v2550_v19 }
  0x56   :  { %323 = vmatprep.subr.mxu0 %v2530_v12  ;;  %1901 = vmatprep.subr.mxu1 %v3354_v0 }
  0x57   :  { %324 = vmatpush1.msra.mxu0 %v2533_v13  ;;  %1902 = vmatpush3.msra.mxu1 %v2560_v22 }
  0x58   :  { %325 = vmatprep.subr.mxu0 %v2536_v14  ;;  %1903 = vmatprep.subr.mxu1 %v3354_v0 }
  0x59   :  { %326 = vmatpush1.msra.mxu0 %v2541_v16  ;;  %1904 = vmatpush3.msra.mxu1 %v2570_v25 }
  0x5a   :  { %327 = vmatprep.subr.mxu0 %v2547_v18  ;;  %1905 = vmatprep.subr.mxu1 %v3354_v0 }
  0x5b   :  { %328 = vmatpush1.msra.mxu0 %v2553_v20  ;;  %1906 = vmatpush3.msra.mxu1 %v2580_v28 }
  0x5c   :  { %329 = vmatprep.subr.mxu0 %v2557_v21  ;;  %1907 = vmatprep.subr.mxu1 %v3354_v0 }
  0x5d   :  { %330 = vmatpush1.msra.mxu0 %v2563_v23  ;;  %1908 = vmatpush3.msra.mxu1 %v2590_v31 }
  0x5e   :  { %331 = vmatprep.subr.mxu0 %v2567_v24  ;;  %1909 = vmatprep.subr.mxu1 %v3354_v0 }
  0x5f   :  { %332 = vmatpush1.msra.mxu0 %v2573_v26  ;;  %1910 = vmatpush3.msra.mxu1 %v2600_v34 }
  0x60   :  { %333 = vmatprep.subr.mxu0 %v2577_v27  ;;  %1911 = vmatprep.subr.mxu1 %v3354_v0 }
  0x61   :  { %334 = vmatpush1.msra.mxu0 %v2583_v29  ;;  %1912 = vmatpush3.msra.mxu1 %v2610_v37 }
  0x62   :  { %335 = vmatprep.subr.mxu0 %v2587_v30  ;;  %1913 = vmatprep.subr.mxu1 %v3354_v0 }
  0x63   :  { %336 = vmatpush1.msra.mxu0 %v2593_v32  ;;  %1914 = vmatpush3.msra.mxu1 %v2625_v41 }
  0x64   :  { %337 = vmatprep.subr.mxu0 %v2597_v33  ;;  %1915 = vmatprep.subr.mxu1 %v3354_v0 }
  0x65   :  { %338 = vmatpush1.msra.mxu0 %v2603_v35  ;;  %1916 = vmatpush3.msra.mxu1 %v2635_v44 }
  0x66   :  { %339 = vmatprep.subr.mxu0 %v2607_v36  ;;  %1917 = vmatprep.subr.mxu1 %v3354_v0 }
  0x67   :  { %340 = vmatpush1.msra.mxu0 %v2613_v38  ;;  %1918 = vmatpush3.msra.mxu1 %v2649_v47 }
  0x68   :  { %341 = vmatprep.subr.mxu0 %v2622_v40  ;;  %1919 = vmatprep.subr.mxu1 %v3354_v0 }
  0x69   :  { %342 = vmatpush1.msra.mxu0 %v2628_v42  ;;  %1920 = vmatpush3.msra.mxu1 %v2656_v49 }
  0x6a   :  { %343 = vmatprep.subr.mxu0 %v2632_v43  ;;  %1921 = vmatprep.subr.mxu1 %v3354_v0 }
  0x6b   :  { %344 = vmatpush1.msra.mxu0 %v2639_v45  ;;  %1922 = vmatpush3.msra.mxu1 %v2662_v50 }
  0x6c   :  { %377 = vmatprep.mubr.f32.mxu0 %v3354_v0  ;;  %1923 = vmatprep.subr.mxu1 %v3354_v0 }
  0x6d   :  { %1927 = vmatprep.mubr.msk.f32.mxu1 %vm2438_vm0, %v3354_v0  ;;  %1924 = vmatpush3.msra.mxu1 %v2668_v52 }
  0x6e   :  { %489 = vmatprep.subr.mxu0 %v2502_v2  ;;  %1925 = vmatprep.subr.mxu1 %v3354_v0 }
  0x6f   :  { %1926 = vmatpush3.msra.mxu1 %v2675_v53 }
  0x70   :  { %1930 = vmatprep.subr.mxu1 %v3354_v0  ;;  %v2753_v0 = vld [vmem:[%s3347_s4] ss:$0 sm:$0xff] }
 0x10a   :  { %v198_v57 = vpop.f32.mrf.mxu0 }
 0x10b   :  { %v273_v58 = vadd.f32 %v198_v57, %v129_v56 }
 0x10c   :  { %v200_v61 = vpop.f32.mrf.mxu0 }
 0x10d   :  { %v1681_v59 = vmul.f32 -1.442695, %v273_v58  ;;  %v280_v62 = vadd.f32 %v200_v61, %v130_v60  ;;  %v131_v58 = vld [vmem:[#allocation3 + $0x10] sm:$0xff] }
 0x10f   :  { %2189 = vpow2.f32 %v1681_v59  ;;  %v269_v63 = vpop.f32.mrf.mxu1  ;;  %v1682_v48 = vmul.f32 -1.442695, %v280_v62 }
 0x110   :  { %v293_v56 = vadd.f32 %v2753_v0, %v269_v63  ;;  %v3379_v63 = vmov 0  }
 0x111   :  { %v1894_v51 = vpop.f32.mrf.mxu1  ;;  %2191 = vpow2.f32 %v1682_v48 }
 0x112   :  { %v306_v51 = vpop.permute.xlu0 %305 }
 0x113   :  { %vm307_vm5 = vcmp.eq.s32.totalorder %v306_v51, 1 }
 0x11c   :  { %v2190_v54 = vpop.eup %2189 }
 0x11d   :  { %v277_v55 = vadd.f32 1.0, %v2190_v54 }
 0x11e   :  { %v2192_v1 = vpop.eup %2191 }
 0x11f   :  { %2193 = vrcp.f32 %v277_v55  ;;  %v284_v39 = vadd.f32 1.0, %v2192_v1  ;;  %v3375_v1 = vmov 0.0  }
 0x121   :  { %2195 = vrcp.f32 %v284_v39  ;;  %v3377_v39 = vld [vmem:[#allocation16_spill] sm:$0xff] }
 0x12c   :  { %v2194_v57 = vpop.eup %2193 }
 0x12d   :  { %v294_v59 = vmul.f32 %v2194_v57, %v293_v56 }
 0x12e   :  { %v2196_v61 = vpop.eup %2195 }
 0x12f   :  { %v295_v60 = vadd.f32 %v294_v59, %v131_v58  ;;  %v297_v62 = vsub.f32 1.0, %v2196_v61  ;;  %v299_v55 = vmul.f32 %v2196_v61, %v2646_v46 }
 0x131   :  { %2197 = vtanh.f32 %v295_v60  ;;  %v310_v60 = vld [vmem:[#allocation3 + $0x18] sm:$0xff] }
 0x13e   :  { %v2198_v48 = vpop.eup %2197 }
 0x13f   :  { %v298_v54 = vmul.f32 %v2198_v48, %v297_v62 }
 0x141   :  { %v300_v2 = vadd.f32 %v299_v55, %v298_v54  ;;  %v311_v55 = vld [vmem:[#allocation3 + $0x20] sm:$0xff] }
 0x143   :  { %v2758_v53 = vsel %vm307_vm5, %v300_v2, %v2646_v46  ;;  %v3376_v2 = vld [vmem:[#allocation21_spill] sm:$0xff] }
 0x144   :  { %378 = vmatmul.mubr.f32.vlgmr.msra.gmra.mxu0 %v2758_v53  ;;  %1928 = vmatmul.mubr.f32.vlgmr.msra.gmra.mxu1 %v2758_v53  ;;  %v3378_v46 = vld [vmem:[#allocation17_spill] sm:$0xff] }
 0x145   :  { %490 = vmatpush1.msra.mxu0 %v2504_v3  ;;  %1931 = vmatpush3.msra.mxu1 %v2538_v15  ;;  %vm1690_vm6 = vcmp.gt.s32.totalorder %v3378_v46, 2  ;;  %vm1693_vm7 = vcmp.gt.s32.totalorder %v3378_v46, 3  ;;  %vm1699_vm8 = vcmp.gt.s32.totalorder %v3378_v46, 5  ;;  %vm1705_vm9 = vcmp.gt.s32.totalorder %v3378_v46, 7 }
 0x146   :  { %491 = vmatprep.subr.mxu0 %v2506_v4  ;;  %1932 = vmatprep.subr.mxu1 %v3375_v1  ;;  %v655_v56 = vsel %vm1690_vm6, 1, %v3379_v63  ;;  %v831_v57 = vsel %vm1693_vm7, 1, %v3379_v63  ;;  %v1183_v58 = vsel %vm1699_vm8, 1, %v3379_v63  ;;  %v1535_v59 = vsel %vm1705_vm9, 1, %v3379_v63 }
 0x147   :  { %492 = vmatpush1.msra.mxu0 %v2509_v5  ;;  %1933 = vmatpush3.msra.mxu1 %v2544_v17 }
 0x148   :  { %493 = vmatprep.subr.mxu0 %v2512_v6  ;;  %1934 = vmatprep.subr.mxu1 %v3375_v1 }
 0x149   :  { %494 = vmatpush1.msra.mxu0 %v2515_v7  ;;  %1935 = vmatpush3.msra.mxu1 %v2550_v19 }
 0x14a   :  { %495 = vmatprep.subr.mxu0 %v2518_v8  ;;  %1936 = vmatprep.subr.mxu1 %v3375_v1 }
 0x14b   :  { %496 = vmatpush1.msra.mxu0 %v2521_v9  ;;  %1937 = vmatpush3.msra.mxu1 %v2560_v22 }
 0x14c   :  { %497 = vmatprep.subr.mxu0 %v2524_v10  ;;  %1938 = vmatprep.subr.mxu1 %v3375_v1 }
 0x14d   :  { %498 = vmatpush1.msra.mxu0 %v2527_v11  ;;  %1939 = vmatpush3.msra.mxu1 %v2570_v25 }
 0x14e   :  { %499 = vmatprep.subr.mxu0 %v2530_v12  ;;  %1940 = vmatprep.subr.mxu1 %v3375_v1 }
 0x14f   :  { %500 = vmatpush1.msra.mxu0 %v2533_v13  ;;  %1941 = vmatpush3.msra.mxu1 %v2580_v28 }
 0x150   :  { %501 = vmatprep.subr.mxu0 %v2536_v14  ;;  %1942 = vmatprep.subr.mxu1 %v3375_v1 }
 0x151   :  { %502 = vmatpush1.msra.mxu0 %v2541_v16  ;;  %1943 = vmatpush3.msra.mxu1 %v2590_v31 }
 0x152   :  { %503 = vmatprep.subr.mxu0 %v2547_v18  ;;  %1944 = vmatprep.subr.mxu1 %v3375_v1 }
 0x153   :  { %504 = vmatpush1.msra.mxu0 %v2553_v20  ;;  %1945 = vmatpush3.msra.mxu1 %v2600_v34 }
 0x154   :  { %505 = vmatprep.subr.mxu0 %v2557_v21  ;;  %1946 = vmatprep.subr.mxu1 %v3375_v1 }
 0x155   :  { %506 = vmatpush1.msra.mxu0 %v2563_v23  ;;  %1947 = vmatpush3.msra.mxu1 %v2610_v37 }
 0x156   :  { %507 = vmatprep.subr.mxu0 %v2567_v24  ;;  %1948 = vmatprep.subr.mxu1 %v3375_v1 }
 0x157   :  { %508 = vmatpush1.msra.mxu0 %v2573_v26  ;;  %1949 = vmatpush3.msra.mxu1 %v2625_v41 }
 0x158   :  { %509 = vmatprep.subr.mxu0 %v2577_v27  ;;  %1950 = vmatprep.subr.mxu1 %v3375_v1 }
 0x159   :  { %510 = vmatpush1.msra.mxu0 %v2583_v29  ;;  %1951 = vmatpush3.msra.mxu1 %v2635_v44 }
 0x15a   :  { %511 = vmatprep.subr.mxu0 %v2587_v30  ;;  %1952 = vmatprep.subr.mxu1 %v3375_v1 }
 0x15b   :  { %512 = vmatpush1.msra.mxu0 %v2593_v32  ;;  %1953 = vmatpush3.msra.mxu1 %v2649_v47 }
 0x15c   :  { %513 = vmatprep.subr.mxu0 %v2597_v33  ;;  %1954 = vmatprep.subr.mxu1 %v3375_v1 }
 0x15d   :  { %514 = vmatpush1.msra.mxu0 %v2603_v35  ;;  %1955 = vmatpush3.msra.mxu1 %v2656_v49 }
 0x15e   :  { %515 = vmatprep.subr.mxu0 %v2607_v36  ;;  %1956 = vmatprep.subr.mxu1 %v3375_v1 }
 0x15f   :  { %516 = vmatpush1.msra.mxu0 %v2613_v38  ;;  %1957 = vmatpush3.msra.mxu1 %v2662_v50 }
 0x160   :  { %517 = vmatprep.subr.mxu0 %v2622_v40  ;;  %1958 = vmatprep.subr.mxu1 %v3375_v1 }
 0x161   :  { %518 = vmatpush1.msra.mxu0 %v2628_v42  ;;  %1959 = vmatpush3.msra.mxu1 %v2668_v52 }
 0x162   :  { %519 = vmatprep.subr.mxu0 %v2632_v43  ;;  %1960 = vmatprep.subr.mxu1 %v3375_v1  ;;  %v312_v43 = vld [vmem:[#allocation3 + $0x28] sm:$0xff] }
 0x163   :  { %520 = vmatpush1.msra.mxu0 %v2639_v45  ;;  %553 = vmatprep.mubr.f32.mxu0 %v3375_v1 }
 0x164   :  { %1961 = vmatpush3.msra.mxu1 %v3376_v2  ;;  %1962 = vmatprep.mubr.msk.f32.mxu1 %vm2438_vm0, %v3375_v1 }
 0x165   :  { %665 = vmatprep.subr.mxu0 %v3377_v39  ;;  %1965 = vmatprep.subr.mxu1 %v3375_v1 }
 0x166   :  { %657 = vperm.xlu1 %2188, %v655_v56  }
 0x16a   :  { %833 = vperm.xlu1 %2188, %v831_v57  }
 0x16e   :  { %1185 = vperm.xlu1 %2188, %v1183_v58  }
 0x172   :  { %1537 = vperm.xlu1 %2188, %v1535_v59  }
 0x204   :  { %v379_v61 = vpop.f32.mrf.mxu0  ;;  %v450_v62 = vpop.f32.mrf.mxu1 }
 0x205   :  { %v454_v48 = vadd.f32 %v379_v61, %v310_v60  ;;  %v468_v63 = vadd.f32 %v2753_v0, %v450_v62  ;;  %v3383_v62 = vld [vmem:[#allocation21_spill] sm:$0xff] }
 0x206   :  { %v1929_v51 = vpop.f32.mrf.mxu1  ;;  %v381_v56 = vpop.f32.mrf.mxu0 }
 0x207   :  { %v1685_v54 = vmul.f32 -1.442695, %v454_v48  ;;  %v461_v39 = vadd.f32 %v381_v56, %v311_v55  ;;  %v3384_v56 = vld [vmem:[#allocation16_spill] sm:$0xff] }
 0x209   :  { %2199 = vpow2.f32 %v1685_v54  ;;  %v1686_v2 = vmul.f32 -1.442695, %v461_v39 }
 0x20b   :  { %2201 = vpow2.f32 %v1686_v2  ;;  %v482_v2 = vpop.permute.xlu0 %481 }
 0x20c   :  { %vm483_vm10 = vcmp.eq.s32.totalorder %v482_v2, 1 }
 0x216   :  { %v2200_v57 = vpop.eup %2199 }
 0x217   :  { %v458_v45 = vadd.f32 1.0, %v2200_v57  ;;  %v486_v57 = vld [vmem:[#allocation3 + $0x30] sm:$0xff] }
 0x218   :  { %v2202_v46 = vpop.eup %2201 }
 0x219   :  { %2203 = vrcp.f32 %v458_v45  ;;  %v465_v58 = vadd.f32 1.0, %v2202_v46 }
 0x21b   :  { %2205 = vrcp.f32 %v465_v58 }
 0x226   :  { %v2204_v59 = vpop.eup %2203 }
 0x227   :  { %v469_v52 = vmul.f32 %v2204_v59, %v468_v63 }
 0x228   :  { %v2206_v61 = vpop.eup %2205 }
 0x229   :  { %v470_v60 = vadd.f32 %v469_v52, %v312_v43  ;;  %v472_v48 = vsub.f32 1.0, %v2206_v61  ;;  %v474_v39 = vmul.f32 %v2206_v61, %v2758_v53  ;;  %v3380_v43 = vld [vmem:[#allocation20_spill] sm:$0xff]  ;;  %v3381_v52 = vld [vmem:[#allocation18_spill] sm:$0xff]  ;;  %v487_v61 = vld [vmem:[#allocation3 + $0x38] sm:$0xff] }
 0x22b   :  { %2207 = vtanh.f32 %v470_v60 }
 0x238   :  { %v2208_v51 = vpop.eup %2207 }
 0x239   :  { %v473_v54 = vmul.f32 %v2208_v51, %v472_v48 }
 0x23b   :  { %v475_v55 = vadd.f32 %v474_v39, %v473_v54 }
 0x23d   :  { %v2840_v45 = vsel %vm483_vm10, %v475_v55, %v2758_v53  ;;  %v3382_v53 = vld [vmem:[#allocation19_spill] sm:$0xff] }
 0x23e   :  { %554 = vmatmul.mubr.f32.vlgmr.msra.gmra.mxu0 %v2840_v45  ;;  %1963 = vmatmul.mubr.f32.vlgmr.msra.gmra.mxu1 %v2840_v45 }
 0x23f   :  { %666 = vmatpush1.msra.mxu0 %v2504_v3  ;;  %1966 = vmatpush3.msra.mxu1 %v2538_v15 }
 0x240   :  { %667 = vmatprep.subr.mxu0 %v2506_v4  ;;  %1967 = vmatprep.subr.mxu1 %v3375_v1 }
 0x241   :  { %668 = vmatpush1.msra.mxu0 %v2509_v5  ;;  %1968 = vmatpush3.msra.mxu1 %v2544_v17 }
 0x242   :  { %669 = vmatprep.subr.mxu0 %v2512_v6  ;;  %1969 = vmatprep.subr.mxu1 %v3375_v1 }
 0x243   :  { %670 = vmatpush1.msra.mxu0 %v2515_v7  ;;  %1970 = vmatpush3.msra.mxu1 %v2550_v19 }
 0x244   :  { %671 = vmatprep.subr.mxu0 %v2518_v8  ;;  %1971 = vmatprep.subr.mxu1 %v3375_v1 }
 0x245   :  { %672 = vmatpush1.msra.mxu0 %v2521_v9  ;;  %1972 = vmatpush3.msra.mxu1 %v2560_v22 }
 0x246   :  { %673 = vmatprep.subr.mxu0 %v2524_v10  ;;  %1973 = vmatprep.subr.mxu1 %v3375_v1 }
 0x247   :  { %674 = vmatpush1.msra.mxu0 %v2527_v11  ;;  %1974 = vmatpush3.msra.mxu1 %v2570_v25 }
 0x248   :  { %675 = vmatprep.subr.mxu0 %v2530_v12  ;;  %1975 = vmatprep.subr.mxu1 %v3375_v1 }
 0x249   :  { %676 = vmatpush1.msra.mxu0 %v2533_v13  ;;  %1976 = vmatpush3.msra.mxu1 %v2580_v28 }
 0x24a   :  { %677 = vmatprep.subr.mxu0 %v2536_v14  ;;  %1977 = vmatprep.subr.mxu1 %v3375_v1 }
 0x24b   :  { %678 = vmatpush1.msra.mxu0 %v2541_v16  ;;  %1978 = vmatpush3.msra.mxu1 %v2590_v31 }
 0x24c   :  { %679 = vmatprep.subr.mxu0 %v2547_v18  ;;  %1979 = vmatprep.subr.mxu1 %v3375_v1 }
 0x24d   :  { %680 = vmatpush1.msra.mxu0 %v2553_v20  ;;  %1980 = vmatpush3.msra.mxu1 %v2600_v34 }
 0x24e   :  { %681 = vmatprep.subr.mxu0 %v2557_v21  ;;  %1981 = vmatprep.subr.mxu1 %v3375_v1 }
 0x24f   :  { %682 = vmatpush1.msra.mxu0 %v2563_v23  ;;  %1982 = vmatpush3.msra.mxu1 %v2610_v37 }
 0x250   :  { %683 = vmatprep.subr.mxu0 %v2567_v24  ;;  %1983 = vmatprep.subr.mxu1 %v3375_v1 }
 0x251   :  { %684 = vmatpush1.msra.mxu0 %v2573_v26  ;;  %1984 = vmatpush3.msra.mxu1 %v2625_v41 }
 0x252   :  { %685 = vmatprep.subr.mxu0 %v2577_v27  ;;  %1985 = vmatprep.subr.mxu1 %v3375_v1 }
 0x253   :  { %686 = vmatpush1.msra.mxu0 %v2583_v29  ;;  %1986 = vmatpush3.msra.mxu1 %v2635_v44 }
 0x254   :  { %687 = vmatprep.subr.mxu0 %v2587_v30  ;;  %1987 = vmatprep.subr.mxu1 %v3375_v1 }
 0x255   :  { %688 = vmatpush1.msra.mxu0 %v2593_v32  ;;  %1988 = vmatpush3.msra.mxu1 %v2649_v47 }
 0x256   :  { %689 = vmatprep.subr.mxu0 %v2597_v33  ;;  %1989 = vmatprep.subr.mxu1 %v3375_v1 }
 0x257   :  { %690 = vmatpush1.msra.mxu0 %v2603_v35  ;;  %1990 = vmatpush3.msra.mxu1 %v2656_v49 }
 0x258   :  { %691 = vmatprep.subr.mxu0 %v2607_v36  ;;  %1991 = vmatprep.subr.mxu1 %v3375_v1 }
 0x259   :  { %692 = vmatpush1.msra.mxu0 %v2613_v38  ;;  %1992 = vmatpush3.msra.mxu1 %v2662_v50 }
 0x25a   :  { %693 = vmatprep.subr.mxu0 %v2622_v40  ;;  %1993 = vmatprep.subr.mxu1 %v3375_v1 }
 0x25b   :  { %694 = vmatpush1.msra.mxu0 %v2628_v42  ;;  %1994 = vmatpush3.msra.mxu1 %v3380_v43 }
 0x25c   :  { %695 = vmatprep.subr.mxu0 %v3381_v52  ;;  %1995 = vmatprep.subr.mxu1 %v3375_v1  ;;  %v488_v52 = vld [vmem:[#allocation3 + $0x40] sm:$0xff] }
 0x25d   :  { %696 = vmatpush1.msra.mxu0 %v3382_v53  ;;  %729 = vmatprep.mubr.f32.mxu0 %v3375_v1 }
 0x25e   :  { %1996 = vmatpush3.msra.mxu1 %v3383_v62  ;;  %1997 = vmatprep.mubr.msk.f32.mxu1 %vm2438_vm0, %v3375_v1 }
 0x25f   :  { %841 = vmatprep.subr.mxu0 %v3384_v56  ;;  %2000 = vmatprep.subr.mxu1 %v3375_v1 }
 0x2fe   :  { %v555_v46 = vpop.f32.mrf.mxu0  ;;  %v626_v58 = vpop.f32.mrf.mxu1 }
 0x2ff   :  { %v630_v63 = vadd.f32 %v555_v46, %v486_v57  ;;  %v644_v56 = vadd.f32 %v2753_v0, %v626_v58  ;;  %v3025_v58 = vld [vmem:[#allocation6 + $0x130] sm:$0xff] }
 0x300   :  { %v1964_v59 = vpop.f32.mrf.mxu1  ;;  %v557_v48 = vpop.f32.mrf.mxu0 }
 0x301   :  { %v1688_v60 = vmul.f32 -1.442695, %v630_v63  ;;  %v637_v51 = vadd.f32 %v557_v48, %v487_v61 }
 0x303   :  { %2209 = vpow2.f32 %v1688_v60  ;;  %v1689_v54 = vmul.f32 -1.442695, %v637_v51  ;;  %v658_v60 = vpop.permute.xlu1 %657 }
 0x304   :  { %vm659_vm11 = vcmp.eq.s32.totalorder %v658_v60, 1  ;;  %v3052_v60 = vld [vmem:[#allocation6 + $0xd8] sm:$0xff] }
 0x305   :  { %2211 = vpow2.f32 %v1689_v54 }
 0x310   :  { %v2210_v39 = vpop.eup %2209 }
 0x311   :  { %v634_v2 = vadd.f32 1.0, %v2210_v39  ;;  %v3028_v39 = vld [vmem:[#allocation6 + $0x110] sm:$0xff] }
 0x312   :  { %v2212_v55 = vpop.eup %2211 }
 0x313   :  { %2213 = vrcp.f32 %v634_v2  ;;  %v641_v62 = vadd.f32 1.0, %v2212_v55  ;;  %v3032_v2 = vld [vmem:[#allocation6 + $0x108] sm:$0xff]  ;;  %v3035_v55 = vld [vmem:[#allocation6 + $0x118] sm:$0xff] }
 0x315   :  { %2215 = vrcp.f32 %v641_v62  ;;  %v3018_v62 = vld [vmem:[#allocation6 + $0x128] sm:$0xff] }
 0x320   :  { %v2214_v53 = vpop.eup %2213 }
 0x321   :  { %v645_v43 = vmul.f32 %v2214_v53, %v644_v56  ;;  %v3015_v53 = vld [vmem:[#allocation6 + $0x148] sm:$0xff]  ;;  %v3022_v56 = vld [vmem:[#allocation6 + $0x120] sm:$0xff] }
 0x322   :  { %v2216_v46 = vpop.eup %2215 }
 0x323   :  { %v646_v57 = vadd.f32 %v645_v43, %v488_v52  ;;  %v648_v63 = vsub.f32 1.0, %v2216_v46  ;;  %v650_v48 = vmul.f32 %v2216_v46, %v2840_v45  ;;  %v3008_v43 = vld [vmem:[#allocation6 + $0x140] sm:$0xff]  ;;  %v3012_v52 = vld [vmem:[#allocation6 + $0x138] sm:$0xff]  ;;  %v3042_v46 = vld [vmem:[#allocation6 + $0xf0] sm:$0xff] }
 0x325   :  { %2217 = vtanh.f32 %v646_v57  ;;  %v3038_v57 = vld [vmem:[#allocation6 + $0xf8] sm:$0xff] }
 0x332   :  { %v2218_v59 = vpop.eup %2217 }
 0x333   :  { %v649_v61 = vmul.f32 %v2218_v59, %v648_v63  ;;  %v3045_v63 = vld [vmem:[#allocation6 + $0x100] sm:$0xff] }
 0x334   :  { %v3048_v59 = vld [vmem:[#allocation6 + $0xe0] sm:$0xff] }
 0x335   :  { %v651_v51 = vadd.f32 %v650_v48, %v649_v61  ;;  %v3055_v61 = vld [vmem:[#allocation6 + $0xe8] sm:$0xff] }
 0x336   :  { %v3058_v48 = vld [vmem:[#allocation6 + $0xc8] sm:$0xff] }
 0x337   :  { %v2914_v54 = vsel %vm659_vm11, %v651_v51, %v2840_v45  ;;  %v3005_v45 = vld [vmem:[#allocation6 + $0x160] sm:$0xff] }
 0x338   :  { %730 = vmatmul.mubr.f32.vlgmr.msra.gmra.mxu0 %v2914_v54  ;;  %1998 = vmatmul.mubr.f32.vlgmr.msra.gmra.mxu1 %v2914_v54  ;;  %v3062_v51 = vld [vmem:[#allocation6 + $0xc0] sm:$0xff] }
 0x339   :  { %842 = vmatpush1.msra.mxu0 %v2504_v3  ;;  %2001 = vmatpush3.msra.mxu1 %v2538_v15  ;;  %v3385_v3 = vld [vmem:[#allocation20_spill] sm:$0xff] }
 0x33a   :  { %843 = vmatprep.subr.mxu0 %v2506_v4  ;;  %2002 = vmatprep.subr.mxu1 %v3375_v1  ;;  %v3386_v4 = vld [vmem:[#allocation18_spill] sm:$0xff] }
 0x33b   :  { %844 = vmatpush1.msra.mxu0 %v2509_v5  ;;  %2003 = vmatpush3.msra.mxu1 %v2544_v17  ;;  %v3387_v5 = vld [vmem:[#allocation19_spill] sm:$0xff] }
 0x33c   :  { %845 = vmatprep.subr.mxu0 %v2512_v6  ;;  %2004 = vmatprep.subr.mxu1 %v3375_v1  ;;  %v3388_v6 = vld [vmem:[#allocation21_spill] sm:$0xff] }
 0x33d   :  { %846 = vmatpush1.msra.mxu0 %v2515_v7  ;;  %2005 = vmatpush3.msra.mxu1 %v2550_v19  ;;  %v3389_v7 = vld [vmem:[#allocation16_spill] sm:$0xff] }
 0x33e   :  { %847 = vmatprep.subr.mxu0 %v2518_v8  ;;  %2006 = vmatprep.subr.mxu1 %v3375_v1  ;;  %v662_v8 = vld [vmem:[#allocation3 + $0x48] sm:$0xff] }
 0x33f   :  { %848 = vmatpush1.msra.mxu0 %v2521_v9  ;;  %2007 = vmatpush3.msra.mxu1 %v2560_v22 }
 0x340   :  { %849 = vmatprep.subr.mxu0 %v2524_v10  ;;  %2008 = vmatprep.subr.mxu1 %v3375_v1 }
 0x341   :  { %850 = vmatpush1.msra.mxu0 %v2527_v11  ;;  %2009 = vmatpush3.msra.mxu1 %v2570_v25 }
 0x342   :  { %851 = vmatprep.subr.mxu0 %v2530_v12  ;;  %2010 = vmatprep.subr.mxu1 %v3375_v1 }
 0x343   :  { %852 = vmatpush1.msra.mxu0 %v2533_v13  ;;  %2011 = vmatpush3.msra.mxu1 %v2580_v28 }
 0x344   :  { %853 = vmatprep.subr.mxu0 %v2536_v14  ;;  %2012 = vmatprep.subr.mxu1 %v3375_v1  ;;  %v663_v14 = vld [vmem:[#allocation3 + $0x50] sm:$0xff] }
 0x345   :  { %854 = vmatpush1.msra.mxu0 %v2541_v16  ;;  %2013 = vmatpush3.msra.mxu1 %v2590_v31 }
 0x346   :  { %855 = vmatprep.subr.mxu0 %v2547_v18  ;;  %2014 = vmatprep.subr.mxu1 %v3375_v1 }
 0x347   :  { %856 = vmatpush1.msra.mxu0 %v2553_v20  ;;  %2015 = vmatpush3.msra.mxu1 %v2600_v34 }
 0x348   :  { %857 = vmatprep.subr.mxu0 %v2557_v21  ;;  %2016 = vmatprep.subr.mxu1 %v3375_v1 }
 0x349   :  { %858 = vmatpush1.msra.mxu0 %v2563_v23  ;;  %2017 = vmatpush3.msra.mxu1 %v2610_v37 }
 0x34a   :  { %859 = vmatprep.subr.mxu0 %v2567_v24  ;;  %2018 = vmatprep.subr.mxu1 %v3375_v1  ;;  %v664_v24 = vld [vmem:[#allocation3 + $0x58] sm:$0xff] }
 0x34b   :  { %860 = vmatpush1.msra.mxu0 %v2573_v26  ;;  %2019 = vmatpush3.msra.mxu1 %v2625_v41 }
 0x34c   :  { %861 = vmatprep.subr.mxu0 %v2577_v27  ;;  %2020 = vmatprep.subr.mxu1 %v3375_v1 }
 0x34d   :  { %862 = vmatpush1.msra.mxu0 %v2583_v29  ;;  %2021 = vmatpush3.msra.mxu1 %v2635_v44 }
 0x34e   :  { %863 = vmatprep.subr.mxu0 %v2587_v30  ;;  %2022 = vmatprep.subr.mxu1 %v3375_v1 }
 0x34f   :  { %864 = vmatpush1.msra.mxu0 %v2593_v32  ;;  %2023 = vmatpush3.msra.mxu1 %v2649_v47  ;;  %v834_v32 = vpop.permute.xlu1 %833 }
 0x350   :  { %865 = vmatprep.subr.mxu0 %v2597_v33  ;;  %2024 = vmatprep.subr.mxu1 %v3375_v1  ;;  %vm835_vm12 = vcmp.eq.s32.totalorder %v834_v32, 1 }
 0x351   :  { %866 = vmatpush1.msra.mxu0 %v2603_v35  ;;  %2025 = vmatpush3.msra.mxu1 %v2656_v49 }
 0x352   :  { %867 = vmatprep.subr.mxu0 %v2607_v36  ;;  %2026 = vmatprep.subr.mxu1 %v3375_v1  ;;  %v2992_v36 = vld [vmem:[#allocation6 + $0x168] sm:$0xff] }
 0x353   :  { %868 = vmatpush1.msra.mxu0 %v2613_v38  ;;  %2027 = vmatpush3.msra.mxu1 %v2662_v50  ;;  %v2995_v38 = vld [vmem:[#allocation6 + $0x178] sm:$0xff] }
 0x354   :  { %869 = vmatprep.subr.mxu0 %v2622_v40  ;;  %2028 = vmatprep.subr.mxu1 %v3375_v1  ;;  %v2998_v40 = vld [vmem:[#allocation6 + $0x158] sm:$0xff] }
 0x355   :  { %870 = vmatpush1.msra.mxu0 %v2628_v42  ;;  %2029 = vmatpush3.msra.mxu1 %v3385_v3  ;;  %v3002_v42 = vld [vmem:[#allocation6 + $0x150] sm:$0xff] }
 0x356   :  { %871 = vmatprep.subr.mxu0 %v3386_v4  ;;  %2030 = vmatprep.subr.mxu1 %v3375_v1  ;;  %v3070_v4 = vld [vmem:[#allocation6 + $0xa8] sm:$0xff] }
 0x357   :  { %872 = vmatpush1.msra.mxu0 %v3387_v5  ;;  %905 = vmatprep.mubr.f32.mxu0 %v3375_v1  ;;  %v3074_v5 = vld [vmem:[#allocation6 + $0x98] sm:$0xff] }
 0x358   :  { %2031 = vmatpush3.msra.mxu1 %v3388_v6  ;;  %2032 = vmatprep.mubr.msk.f32.mxu1 %vm2438_vm0, %v3375_v1 }
 0x359   :  { %1017 = vmatprep.subr.mxu0 %v3389_v7  ;;  %2035 = vmatprep.subr.mxu1 %v3375_v1  ;;  %v3078_v7 = vld [vmem:[#allocation6 + $0x90] sm:$0xff] }
 0x3f8   :  { %v731_v9 = vpop.f32.mrf.mxu0  ;;  %v802_v10 = vpop.f32.mrf.mxu1 }
 0x3f9   :  { %v806_v11 = vadd.f32 %v731_v9, %v662_v8  ;;  %v820_v22 = vadd.f32 %v2753_v0, %v802_v10  ;;  %v3086_v8 = vld [vmem:[#allocation6 + $0x78] sm:$0xff]  ;;  %v3094_v9 = vld [vmem:[#allocation6 + $0x60] sm:$0xff]  ;;  %v3102_v10 = vld [vmem:[#allocation6 + $0x48] sm:$0xff] }
 0x3fa   :  { %v1999_v12 = vpop.f32.mrf.mxu1  ;;  %v733_v15 = vpop.f32.mrf.mxu0 }
 0x3fb   :  { %v1691_v13 = vmul.f32 -1.442695, %v806_v11  ;;  %v813_v16 = vadd.f32 %v733_v15, %v663_v14  ;;  %v3110_v11 = vld [vmem:[#allocation6 + $0x30] sm:$0xff]  ;;  %v3118_v12 = vld [vmem:[#allocation6 + $0x18] sm:$0xff] }
 0x3fd   :  { %2219 = vpow2.f32 %v1691_v13  ;;  %v1692_v17 = vmul.f32 -1.442695, %v813_v16  ;;  %v3126_v13 = vld [vmem:[#allocation6] sm:$0xff] }
 0x3ff   :  { %2221 = vpow2.f32 %v1692_v17 }
 0x40a   :  { %v2220_v18 = vpop.eup %2219 }
 0x40b   :  { %v810_v19 = vadd.f32 1.0, %v2220_v18 }
 0x40c   :  { %v2222_v20 = vpop.eup %2221 }
 0x40d   :  { %2223 = vrcp.f32 %v810_v19  ;;  %v817_v21 = vadd.f32 1.0, %v2222_v20  ;;  %v839_v19 = vld [vmem:[#allocation3 + $0x68] sm:$0xff] }
 0x40f   :  { %2225 = vrcp.f32 %v817_v21 }
 0x41a   :  { %v2224_v23 = vpop.eup %2223 }
 0x41b   :  { %v821_v25 = vmul.f32 %v2224_v23, %v820_v22 }
 0x41c   :  { %v2226_v27 = vpop.eup %2225 }
 0x41d   :  { %v822_v26 = vadd.f32 %v821_v25, %v664_v24  ;;  %v824_v28 = vsub.f32 1.0, %v2226_v27  ;;  %v826_v31 = vmul.f32 %v2226_v27, %v2914_v54 }
 0x41f   :  { %2227 = vtanh.f32 %v822_v26 }
 0x42c   :  { %v2228_v29 = vpop.eup %2227 }
 0x42d   :  { %v825_v30 = vmul.f32 %v2228_v29, %v824_v28  ;;  %v840_v28 = vld [vmem:[#allocation3 + $0x70] sm:$0xff] }
 0x42f   :  { %v827_v33 = vadd.f32 %v826_v31, %v825_v30 }
 0x431   :  { %v2988_v35 = vsel %vm835_vm12, %v827_v33, %v2914_v54  ;;  %v3066_v54 = vld [vmem:[#allocation6 + $0xb0] sm:$0xff] }
 0x432   :  { %906 = vmatmul.mubr.f32.vlgmr.msra.gmra.mxu0 %v2988_v35  ;;  %2033 = vmatmul.mubr.f32.vlgmr.msra.gmra.mxu1 %v2988_v35 }
 0x433   :  { %1018 = vmatpush1.msra.mxu0 %v2992_v36  ;;  %2036 = vmatpush3.msra.mxu1 %v2995_v38 }
 0x434   :  { %1019 = vmatprep.subr.mxu0 %v2998_v40  ;;  %2037 = vmatprep.subr.mxu1 %v3375_v1 }
 0x435   :  { %1020 = vmatpush1.msra.mxu0 %v3002_v42  ;;  %2038 = vmatpush3.msra.mxu1 %v3005_v45 }
 0x436   :  { %1021 = vmatprep.subr.mxu0 %v3008_v43  ;;  %2039 = vmatprep.subr.mxu1 %v3375_v1 }
 0x437   :  { %1022 = vmatpush1.msra.mxu0 %v3012_v52  ;;  %2040 = vmatpush3.msra.mxu1 %v3015_v53 }
 0x438   :  { %1023 = vmatprep.subr.mxu0 %v3018_v62  ;;  %2041 = vmatprep.subr.mxu1 %v3375_v1 }
 0x439   :  { %1024 = vmatpush1.msra.mxu0 %v3022_v56  ;;  %2042 = vmatpush3.msra.mxu1 %v3025_v58 }
 0x43a   :  { %1025 = vmatprep.subr.mxu0 %v3028_v39  ;;  %2043 = vmatprep.subr.mxu1 %v3375_v1 }
 0x43b   :  { %1026 = vmatpush1.msra.mxu0 %v3032_v2  ;;  %2044 = vmatpush3.msra.mxu1 %v3035_v55 }
 0x43c   :  { %1027 = vmatprep.subr.mxu0 %v3038_v57  ;;  %2045 = vmatprep.subr.mxu1 %v3375_v1 }
 0x43d   :  { %1028 = vmatpush1.msra.mxu0 %v3042_v46  ;;  %2046 = vmatpush3.msra.mxu1 %v3045_v63 }
 0x43e   :  { %1029 = vmatprep.subr.mxu0 %v3048_v59  ;;  %2047 = vmatprep.subr.mxu1 %v3375_v1 }
 0x43f   :  { %1030 = vmatpush1.msra.mxu0 %v3052_v60  ;;  %2048 = vmatpush3.msra.mxu1 %v3055_v61 }
 0x440   :  { %1031 = vmatprep.subr.mxu0 %v3058_v48  ;;  %2049 = vmatprep.subr.mxu1 %v3375_v1 }
 0x441   :  { %1032 = vmatpush1.msra.mxu0 %v3062_v51  ;;  %2050 = vmatpush3.msra.mxu1 %v2600_v34  ;;  %v3082_v34 = vld [vmem:[#allocation6 + $0x80] sm:$0xff] }
 0x442   :  { %1033 = vmatprep.subr.mxu0 %v3066_v54  ;;  %2051 = vmatprep.subr.mxu1 %v3375_v1 }
 0x443   :  { %1034 = vmatpush1.msra.mxu0 %v3070_v4  ;;  %2052 = vmatpush3.msra.mxu1 %v2610_v37  ;;  %v3090_v37 = vld [vmem:[#allocation6 + $0x68] sm:$0xff] }
 0x444   :  { %1035 = vmatprep.subr.mxu0 %v3074_v5  ;;  %2053 = vmatprep.subr.mxu1 %v3375_v1 }
 0x445   :  { %1036 = vmatpush1.msra.mxu0 %v3078_v7  ;;  %2054 = vmatpush3.msra.mxu1 %v2625_v41  ;;  %v3098_v41 = vld [vmem:[#allocation6 + $0x50] sm:$0xff] }
 0x446   :  { %1037 = vmatprep.subr.mxu0 %v3082_v34  ;;  %2055 = vmatprep.subr.mxu1 %v3375_v1 }
 0x447   :  { %1038 = vmatpush1.msra.mxu0 %v3086_v8  ;;  %2056 = vmatpush3.msra.mxu1 %v2635_v44  ;;  %v3106_v44 = vld [vmem:[#allocation6 + $0x38] sm:$0xff] }
 0x448   :  { %1039 = vmatprep.subr.mxu0 %v3090_v37  ;;  %2057 = vmatprep.subr.mxu1 %v3375_v1 }
 0x449   :  { %1040 = vmatpush1.msra.mxu0 %v3094_v9  ;;  %2058 = vmatpush3.msra.mxu1 %v2649_v47  ;;  %v3114_v47 = vld [vmem:[#allocation6 + $0x20] sm:$0xff] }
 0x44a   :  { %1041 = vmatprep.subr.mxu0 %v3098_v41  ;;  %2059 = vmatprep.subr.mxu1 %v3375_v1 }
 0x44b   :  { %1042 = vmatpush1.msra.mxu0 %v3102_v10  ;;  %2060 = vmatpush3.msra.mxu1 %v2656_v49  ;;  %v3122_v49 = vld [vmem:[#allocation6 + $0x8] sm:$0xff] }
 0x44c   :  { %1043 = vmatprep.subr.mxu0 %v3106_v44  ;;  %2061 = vmatprep.subr.mxu1 %v3375_v1 }
 0x44d   :  { %1044 = vmatpush1.msra.mxu0 %v3110_v11  ;;  %2062 = vmatpush3.msra.mxu1 %v2662_v50  ;;  %v3133_v50 = vld [vmem:[#allocation6 + $0x170] sm:$0xff] }
 0x44e   :  { %1045 = vmatprep.subr.mxu0 %v3114_v47  ;;  %2063 = vmatprep.subr.mxu1 %v3375_v1 }
 0x44f   :  { %1046 = vmatpush1.msra.mxu0 %v3118_v12  ;;  %2064 = vmatpush3.msra.mxu1 %v3385_v3  ;;  %v838_v3 = vld [vmem:[#allocation3 + $0x60] sm:$0xff] }
 0x450   :  { %1047 = vmatprep.subr.mxu0 %v3122_v49  ;;  %2065 = vmatprep.subr.mxu1 %v3375_v1 }
 0x451   :  { %1048 = vmatpush1.msra.mxu0 %v3126_v13  ;;  %1081 = vmatprep.mubr.f32.mxu0 %v3375_v1 }
 0x452   :  { %2066 = vmatpush3.msra.mxu1 %v3388_v6  ;;  %2067 = vmatprep.mubr.msk.f32.mxu1 %vm2438_vm0, %v3375_v1 }
 0x453   :  { %1193 = vmatprep.subr.mxu0 %v3133_v50  ;;  %2070 = vmatprep.subr.mxu1 %v3375_v1 }
 0x4f2   :  { %v907_v14 = vpop.f32.mrf.mxu0  ;;  %v978_v15 = vpop.f32.mrf.mxu1 }
 0x4f3   :  { %v982_v16 = vadd.f32 %v907_v14, %v838_v3  ;;  %v996_v26 = vadd.f32 %v2753_v0, %v978_v15  ;;  %v3173_v0 = vld [vmem:[#allocation6 + $0xd0] sm:$0xff]  ;;  %v3185_v15 = vld [vmem:[#allocation6 + $0xa0] sm:$0xff] }
 0x4f4   :  { %v2034_v17 = vpop.f32.mrf.mxu1  ;;  %v909_v20 = vpop.f32.mrf.mxu0 }
 0x4f5   :  { %v1694_v18 = vmul.f32 -1.442695, %v982_v16  ;;  %v989_v21 = vadd.f32 %v909_v20, %v839_v19  ;;  %v1010_v16 = vpop.permute.xlu0 %1009  ;;  %v3191_v19 = vld [vmem:[#allocation6 + $0x88] sm:$0xff]  ;;  %v3197_v20 = vld [vmem:[#allocation6 + $0x70] sm:$0xff] }
 0x4f6   :  { %vm1011_vm13 = vcmp.eq.s32.totalorder %v1010_v16, 1 }
 0x4f7   :  { %2229 = vpow2.f32 %v1694_v18  ;;  %v1695_v6 = vmul.f32 -1.442695, %v989_v21  ;;  %v3203_v21 = vld [vmem:[#allocation6 + $0x58] sm:$0xff] }
 0x4f9   :  { %2231 = vpow2.f32 %v1695_v6  ;;  %v3209_v6 = vld [vmem:[#allocation6 + $0x40] sm:$0xff] }
 0x504   :  { %v2230_v22 = vpop.eup %2229 }
 0x505   :  { %v986_v23 = vadd.f32 1.0, %v2230_v22  ;;  %v3215_v22 = vld [vmem:[#allocation6 + $0x28] sm:$0xff] }
 0x506   :  { %v2232_v24 = vpop.eup %2231 }
 0x507   :  { %2233 = vrcp.f32 %v986_v23  ;;  %v993_v25 = vadd.f32 1.0, %v2232_v24  ;;  %v3222_v23 = vld [vmem:[#allocation6 + $0x10] sm:$0xff]  ;;  %v1014_v24 = vld [vmem:[#allocation3 + $0x78] sm:$0xff] }
 0x508   :  { %3390 = vst [vmem:[#allocation17_spill] sm:$0xff] %v3222_v23 }
 0x509   :  { %2235 = vrcp.f32 %v993_v25 }
 0x514   :  { %v2234_v27 = vpop.eup %2233 }
 0x515   :  { %v997_v29 = vmul.f32 %v2234_v27, %v996_v26 }
 0x516   :  { %v2236_v31 = vpop.eup %2235 }
 0x517   :  { %v998_v30 = vadd.f32 %v997_v29, %v840_v28  ;;  %v1000_v32 = vsub.f32 1.0, %v2236_v31  ;;  %v1002_v14 = vmul.f32 %v2236_v31, %v2988_v35 }
 0x519   :  { %2237 = vtanh.f32 %v998_v30  ;;  %v1015_v30 = vld [vmem:[#allocation3 + $0x80] sm:$0xff] }
 0x526   :  { %v2238_v33 = vpop.eup %2237 }
 0x527   :  { %v1001_v3 = vmul.f32 %v2238_v33, %v1000_v32 }
 0x529   :  { %v1003_v17 = vadd.f32 %v1002_v14, %v1001_v3 }
 0x52b   :  { %v3140_v18 = vsel %vm1011_vm13, %v1003_v17, %v2988_v35  ;;  %v3179_v35 = vld [vmem:[#allocation6 + $0xb8] sm:$0xff] }
 0x52c   :  { %1082 = vmatmul.mubr.f32.vlgmr.msra.gmra.mxu0 %v3140_v18  ;;  %2068 = vmatmul.mubr.f32.vlgmr.msra.gmra.mxu1 %v3140_v18 }
 0x52d   :  { %1194 = vmatpush1.msra.mxu0 %v2992_v36  ;;  %2071 = vmatpush3.msra.mxu1 %v2995_v38 }
 0x52e   :  { %1195 = vmatprep.subr.mxu0 %v2998_v40  ;;  %2072 = vmatprep.subr.mxu1 %v3375_v1 }
 0x52f   :  { %1196 = vmatpush1.msra.mxu0 %v3002_v42  ;;  %2073 = vmatpush3.msra.mxu1 %v3005_v45 }
 0x530   :  { %1197 = vmatprep.subr.mxu0 %v3008_v43  ;;  %2074 = vmatprep.subr.mxu1 %v3375_v1 }
 0x531   :  { %1198 = vmatpush1.msra.mxu0 %v3012_v52  ;;  %2075 = vmatpush3.msra.mxu1 %v3015_v53 }
 0x532   :  { %1199 = vmatprep.subr.mxu0 %v3018_v62  ;;  %2076 = vmatprep.subr.mxu1 %v3375_v1 }
 0x533   :  { %1200 = vmatpush1.msra.mxu0 %v3022_v56  ;;  %2077 = vmatpush3.msra.mxu1 %v3025_v58 }
 0x534   :  { %1201 = vmatprep.subr.mxu0 %v3028_v39  ;;  %2078 = vmatprep.subr.mxu1 %v3375_v1 }
 0x535   :  { %1202 = vmatpush1.msra.mxu0 %v3032_v2  ;;  %2079 = vmatpush3.msra.mxu1 %v3035_v55 }
 0x536   :  { %1203 = vmatprep.subr.mxu0 %v3038_v57  ;;  %2080 = vmatprep.subr.mxu1 %v3375_v1 }
 0x537   :  { %1204 = vmatpush1.msra.mxu0 %v3042_v46  ;;  %2081 = vmatpush3.msra.mxu1 %v3045_v63 }
 0x538   :  { %1205 = vmatprep.subr.mxu0 %v3048_v59  ;;  %2082 = vmatprep.subr.mxu1 %v3375_v1 }
 0x539   :  { %1206 = vmatpush1.msra.mxu0 %v3052_v60  ;;  %2083 = vmatpush3.msra.mxu1 %v3055_v61 }
 0x53a   :  { %1207 = vmatprep.subr.mxu0 %v3058_v48  ;;  %2084 = vmatprep.subr.mxu1 %v3375_v1 }
 0x53b   :  { %1208 = vmatpush1.msra.mxu0 %v3062_v51  ;;  %2085 = vmatpush3.msra.mxu1 %v3173_v0 }
 0x53c   :  { %1209 = vmatprep.subr.mxu0 %v3066_v54  ;;  %2086 = vmatprep.subr.mxu1 %v3375_v1 }
 0x53d   :  { %1210 = vmatpush1.msra.mxu0 %v3070_v4  ;;  %2087 = vmatpush3.msra.mxu1 %v3179_v35 }
 0x53e   :  { %1211 = vmatprep.subr.mxu0 %v3074_v5  ;;  %2088 = vmatprep.subr.mxu1 %v3375_v1 }
 0x53f   :  { %1212 = vmatpush1.msra.mxu0 %v3078_v7  ;;  %2089 = vmatpush3.msra.mxu1 %v3185_v15 }
 0x540   :  { %1213 = vmatprep.subr.mxu0 %v3082_v34  ;;  %2090 = vmatprep.subr.mxu1 %v3375_v1 }
 0x541   :  { %1214 = vmatpush1.msra.mxu0 %v3086_v8  ;;  %2091 = vmatpush3.msra.mxu1 %v3191_v19 }
 0x542   :  { %1215 = vmatprep.subr.mxu0 %v3090_v37  ;;  %2092 = vmatprep.subr.mxu1 %v3375_v1 }
 0x543   :  { %1216 = vmatpush1.msra.mxu0 %v3094_v9  ;;  %2093 = vmatpush3.msra.mxu1 %v3197_v20 }
 0x544   :  { %1217 = vmatprep.subr.mxu0 %v3098_v41  ;;  %2094 = vmatprep.subr.mxu1 %v3375_v1 }
 0x545   :  { %1218 = vmatpush1.msra.mxu0 %v3102_v10  ;;  %2095 = vmatpush3.msra.mxu1 %v3203_v21 }
 0x546   :  { %1219 = vmatprep.subr.mxu0 %v3106_v44  ;;  %2096 = vmatprep.subr.mxu1 %v3375_v1 }
 0x547   :  { %1220 = vmatpush1.msra.mxu0 %v3110_v11  ;;  %2097 = vmatpush3.msra.mxu1 %v3209_v6 }
 0x548   :  { %1221 = vmatprep.subr.mxu0 %v3114_v47  ;;  %2098 = vmatprep.subr.mxu1 %v3375_v1 }
 0x549   :  { %1222 = vmatpush1.msra.mxu0 %v3118_v12  ;;  %2099 = vmatpush3.msra.mxu1 %v3215_v22 }
 0x54a   :  { %1223 = vmatprep.subr.mxu0 %v3122_v49  ;;  %2100 = vmatprep.subr.mxu1 %v3375_v1 }
 0x54b   :  { %1224 = vmatpush1.msra.mxu0 %v3126_v13  ;;  %1257 = vmatprep.mubr.f32.mxu0 %v3375_v1 }
 0x54c   :  { %2101 = vmatpush3.msra.mxu1 %v3222_v23  ;;  %2102 = vmatprep.mubr.msk.f32.mxu1 %vm2438_vm0, %v3375_v1 }
 0x54d   :  { %1369 = vmatprep.subr.mxu0 %v3133_v50  ;;  %2105 = vmatprep.subr.mxu1 %v3375_v1  ;;  %v3232_v50 = vld [vmem:[%s3347_s4] ss:$0 sm:$0xff] }
 0x5ec   :  { %v1083_v25 = vpop.f32.mrf.mxu0  ;;  %v1154_v26 = vpop.f32.mrf.mxu1 }
 0x5ed   :  { %v1158_v27 = vadd.f32 %v1083_v25, %v1014_v24  ;;  %v1172_v24 = vadd.f32 %v3232_v50, %v1154_v26 }
 0x5ee   :  { %v2069_v28 = vpop.f32.mrf.mxu1  ;;  %v1085_v31 = vpop.f32.mrf.mxu0 }
 0x5ef   :  { %v1697_v29 = vmul.f32 -1.442695, %v1158_v27  ;;  %v1165_v32 = vadd.f32 %v1085_v31, %v1015_v30  ;;  %v1016_v27 = vld [vmem:[#allocation3 + $0x88] sm:$0xff] }
 0x5f1   :  { %2239 = vpow2.f32 %v1697_v29  ;;  %v1698_v33 = vmul.f32 -1.442695, %v1165_v32 }
 0x5f3   :  { %2241 = vpow2.f32 %v1698_v33 }
 0x5fe   :  { %v2240_v3 = vpop.eup %2239 }
 0x5ff   :  { %v1162_v14 = vadd.f32 1.0, %v2240_v3 }
 0x600   :  { %v2242_v16 = vpop.eup %2241 }
 0x601   :  { %2243 = vrcp.f32 %v1162_v14  ;;  %v1169_v17 = vadd.f32 1.0, %v2242_v16  ;;  %v1186_v14 = vpop.permute.xlu1 %1185 }
 0x602   :  { %vm1187_vm14 = vcmp.eq.s32.totalorder %v1186_v14, 1 }
 0x603   :  { %2245 = vrcp.f32 %v1169_v17 }
 0x60e   :  { %v2244_v25 = vpop.eup %2243 }
 0x60f   :  { %v1173_v28 = vmul.f32 %v2244_v25, %v1172_v24  ;;  %v1367_v24 = vld [vmem:[#allocation3 + $0xb0] sm:$0xff] }
 0x610   :  { %v2246_v30 = vpop.eup %2245 }
 0x611   :  { %v1174_v29 = vadd.f32 %v1173_v28, %v1016_v27  ;;  %v1176_v31 = vsub.f32 1.0, %v2246_v30  ;;  %v1178_v3 = vmul.f32 %v2246_v30, %v3140_v18 }
 0x613   :  { %2247 = vtanh.f32 %v1174_v29 }
 0x620   :  { %v2248_v32 = vpop.eup %2247 }
 0x621   :  { %v1177_v33 = vmul.f32 %v2248_v32, %v1176_v31 }
 0x623   :  { %v1179_v16 = vadd.f32 %v1178_v3, %v1177_v33  ;;  %v1368_v3 = vld [vmem:[#allocation3 + $0xb8] sm:$0xff] }
 0x625   :  { %v3237_v23 = vsel %vm1187_vm14, %v1179_v16, %v3140_v18  ;;  %v1550_v18 = vld [vmem:[#allocation8 + $0x28] sm:$0xff] }
 0x626   :  { %1258 = vmatmul.mubr.f32.vlgmr.msra.gmra.mxu0 %v3237_v23  ;;  %2103 = vmatmul.mubr.f32.vlgmr.msra.gmra.mxu1 %v3237_v23 }
 0x627   :  { %1370 = vmatpush1.msra.mxu0 %v2992_v36  ;;  %2106 = vmatpush3.msra.mxu1 %v2995_v38  ;;  %v3391_v36 = vld [vmem:[#allocation17_spill] sm:$0xff]  ;;  %v1190_v38 = vld [vmem:[#allocation3 + $0x90] sm:$0xff] }
 0x628   :  { %1371 = vmatprep.subr.mxu0 %v2998_v40  ;;  %2107 = vmatprep.subr.mxu1 %v3375_v1 }
 0x629   :  { %1372 = vmatpush1.msra.mxu0 %v3002_v42  ;;  %2108 = vmatpush3.msra.mxu1 %v3005_v45 }
 0x62a   :  { %1373 = vmatprep.subr.mxu0 %v3008_v43  ;;  %2109 = vmatprep.subr.mxu1 %v3375_v1 }
 0x62b   :  { %1374 = vmatpush1.msra.mxu0 %v3012_v52  ;;  %2110 = vmatpush3.msra.mxu1 %v3015_v53  ;;  %v1191_v53 = vld [vmem:[#allocation3 + $0x98] sm:$0xff] }
 0x62c   :  { %1375 = vmatprep.subr.mxu0 %v3018_v62  ;;  %2111 = vmatprep.subr.mxu1 %v3375_v1 }
 0x62d   :  { %1376 = vmatpush1.msra.mxu0 %v3022_v56  ;;  %2112 = vmatpush3.msra.mxu1 %v3025_v58 }
 0x62e   :  { %1377 = vmatprep.subr.mxu0 %v3028_v39  ;;  %2113 = vmatprep.subr.mxu1 %v3375_v1 }
 0x62f   :  { %1378 = vmatpush1.msra.mxu0 %v3032_v2  ;;  %2114 = vmatpush3.msra.mxu1 %v3035_v55 }
 0x630   :  { %1379 = vmatprep.subr.mxu0 %v3038_v57  ;;  %2115 = vmatprep.subr.mxu1 %v3375_v1 }
 0x631   :  { %1380 = vmatpush1.msra.mxu0 %v3042_v46  ;;  %2116 = vmatpush3.msra.mxu1 %v3045_v63 }
 0x632   :  { %1381 = vmatprep.subr.mxu0 %v3048_v59  ;;  %2117 = vmatprep.subr.mxu1 %v3375_v1  ;;  %v1192_v59 = vld [vmem:[#allocation3 + $0xa0] sm:$0xff] }
 0x633   :  { %1382 = vmatpush1.msra.mxu0 %v3052_v60  ;;  %2118 = vmatpush3.msra.mxu1 %v3055_v61 }
 0x634   :  { %1383 = vmatprep.subr.mxu0 %v3058_v48  ;;  %2119 = vmatprep.subr.mxu1 %v3375_v1 }
 0x635   :  { %1384 = vmatpush1.msra.mxu0 %v3062_v51  ;;  %2120 = vmatpush3.msra.mxu1 %v3173_v0  ;;  %v1549_v0 = vld [vmem:[#allocation8 + $0x20] sm:$0xff] }
 0x636   :  { %1385 = vmatprep.subr.mxu0 %v3066_v54  ;;  %2121 = vmatprep.subr.mxu1 %v3375_v1 }
 0x637   :  { %1386 = vmatpush1.msra.mxu0 %v3070_v4  ;;  %2122 = vmatpush3.msra.mxu1 %v3179_v35  ;;  %v1362_v4 = vpop.permute.xlu0 %1361  ;;  %v1548_v35 = vld [vmem:[#allocation8 + $0x18] sm:$0xff] }
 0x638   :  { %1387 = vmatprep.subr.mxu0 %v3074_v5  ;;  %2123 = vmatprep.subr.mxu1 %v3375_v1  ;;  %vm1363_vm15 = vcmp.eq.s32.totalorder %v1362_v4, 1 }
 0x639   :  { %1388 = vmatpush1.msra.mxu0 %v3078_v7  ;;  %2124 = vmatpush3.msra.mxu1 %v3185_v15  ;;  %v1547_v15 = vld [vmem:[#allocation8 + $0x10] sm:$0xff] }
 0x63a   :  { %1389 = vmatprep.subr.mxu0 %v3082_v34  ;;  %2125 = vmatprep.subr.mxu1 %v3375_v1 }
 0x63b   :  { %1390 = vmatpush1.msra.mxu0 %v3086_v8  ;;  %2126 = vmatpush3.msra.mxu1 %v3191_v19  ;;  %v1546_v19 = vld [vmem:[#allocation8 + $0x8] sm:$0xff] }
 0x63c   :  { %1391 = vmatprep.subr.mxu0 %v3090_v37  ;;  %2127 = vmatprep.subr.mxu1 %v3375_v1  ;;  %v1560_v37 = vld [vmem:[#allocation8 + $0x78] sm:$0xff] }
 0x63d   :  { %1392 = vmatpush1.msra.mxu0 %v3094_v9  ;;  %2128 = vmatpush3.msra.mxu1 %v3197_v20  ;;  %v1559_v9 = vld [vmem:[#allocation8 + $0x70] sm:$0xff]  ;;  %v1545_v20 = vld [vmem:[#allocation8] sm:$0xff] }
 0x63e   :  { %1393 = vmatprep.subr.mxu0 %v3098_v41  ;;  %2129 = vmatprep.subr.mxu1 %v3375_v1  ;;  %v1558_v41 = vld [vmem:[#allocation8 + $0x68] sm:$0xff] }
 0x63f   :  { %1394 = vmatpush1.msra.mxu0 %v3102_v10  ;;  %2130 = vmatpush3.msra.mxu1 %v3203_v21  ;;  %v1557_v10 = vld [vmem:[#allocation8 + $0x60] sm:$0xff]  ;;  %v1366_v21 = vld [vmem:[#allocation3 + $0xa8] sm:$0xff] }
 0x640   :  { %1395 = vmatprep.subr.mxu0 %v3106_v44  ;;  %2131 = vmatprep.subr.mxu1 %v3375_v1  ;;  %v1556_v44 = vld [vmem:[#allocation8 + $0x58] sm:$0xff] }
 0x641   :  { %1396 = vmatpush1.msra.mxu0 %v3110_v11  ;;  %2132 = vmatpush3.msra.mxu1 %v3209_v6  ;;  %v1555_v11 = vld [vmem:[#allocation8 + $0x50] sm:$0xff] }
 0x642   :  { %1397 = vmatprep.subr.mxu0 %v3114_v47  ;;  %2133 = vmatprep.subr.mxu1 %v3375_v1  ;;  %v1554_v47 = vld [vmem:[#allocation8 + $0x48] sm:$0xff] }
 0x643   :  { %1398 = vmatpush1.msra.mxu0 %v3118_v12  ;;  %2134 = vmatpush3.msra.mxu1 %v3215_v22  ;;  %v1553_v12 = vld [vmem:[#allocation8 + $0x40] sm:$0xff] }
 0x644   :  { %1399 = vmatprep.subr.mxu0 %v3122_v49  ;;  %2135 = vmatprep.subr.mxu1 %v3375_v1  ;;  %v1552_v49 = vld [vmem:[#allocation8 + $0x38] sm:$0xff] }
 0x645   :  { %1400 = vmatpush1.msra.mxu0 %v3126_v13  ;;  %1433 = vmatprep.mubr.f32.mxu0 %v3375_v1  ;;  %v1551_v13 = vld [vmem:[#allocation8 + $0x30] sm:$0xff] }
 0x646   :  { %2136 = vmatpush3.msra.mxu1 %v3391_v36  ;;  %2137 = vmatprep.mubr.msk.f32.mxu1 %vm2438_vm0, %v3375_v1 }
 0x647   :  { %2140 = vmatprep.subr.mxu0 %v3375_v1 }
 0x6e6   :  { %v1259_v40 = vpop.f32.mrf.mxu0  ;;  %v1330_v42 = vpop.f32.mrf.mxu1 }
 0x6e7   :  { %v1334_v45 = vadd.f32 %v1259_v40, %v1190_v38  ;;  %v1348_v46 = vadd.f32 %v3232_v50, %v1330_v42  ;;  %v1538_v42 = vpop.permute.xlu1 %1537 }
 0x6e8   :  { %v2104_v43 = vpop.f32.mrf.mxu1  ;;  %v1261_v62 = vpop.f32.mrf.mxu0 }
 0x6e9   :  { %v1700_v52 = vmul.f32 -1.442695, %v1334_v45  ;;  %v1341_v56 = vadd.f32 %v1261_v62, %v1191_v53 }
 0x6eb   :  { %2249 = vpow2.f32 %v1700_v52  ;;  %v1701_v58 = vmul.f32 -1.442695, %v1341_v56 }
 0x6ed   :  { %2251 = vpow2.f32 %v1701_v58 }
 0x6f8   :  { %v2250_v39 = vpop.eup %2249 }
 0x6f9   :  { %v1338_v2 = vadd.f32 1.0, %v2250_v39 }
 0x6fa   :  { %v2252_v55 = vpop.eup %2251 }
 0x6fb   :  { %2253 = vrcp.f32 %v1338_v2  ;;  %v1345_v57 = vadd.f32 1.0, %v2252_v55 }
 0x6fd   :  { %2255 = vrcp.f32 %v1345_v57 }
 0x708   :  { %v2254_v63 = vpop.eup %2253 }
 0x709   :  { %v1349_v60 = vmul.f32 %v2254_v63, %v1348_v46 }
 0x70a   :  { %v2256_v48 = vpop.eup %2255 }
 0x70b   :  { %v1350_v61 = vadd.f32 %v1349_v60, %v1192_v59  ;;  %v1352_v51 = vsub.f32 1.0, %v2256_v48  ;;  %v1354_v7 = vmul.f32 %v2256_v48, %v3237_v23 }
 0x70d   :  { %2257 = vtanh.f32 %v1350_v61 }
 0x71a   :  { %v2258_v54 = vpop.eup %2257 }
 0x71b   :  { %v1353_v5 = vmul.f32 %v2258_v54, %v1352_v51 }
 0x71d   :  { %v1355_v34 = vadd.f32 %v1354_v7, %v1353_v5 }
 0x71f   :  { %v3310_v8 = vsel %vm1363_vm15, %v1355_v34, %v3237_v23 }
 0x720   :  { %1434 = vmatmul.mubr.f32.vlgmr.msra.gmra.mxu0 %v3310_v8  ;;  %2138 = vmatmul.mubr.f32.vlgmr.msra.gmra.mxu1 %v3310_v8 }
 0x721   :  { %2172 = vmatprep.mubr.msk.f32.mxu0 %vm2438_vm0, %v3375_v1  ;;  %2141 = vmatpush3.msra.mxu0 %v1560_v37  ;;  %vm1539_vm0 = vcmp.eq.s32.totalorder %v1538_v42, 1 }
 0x722   :  { %2142 = vmatprep.subr.mxu0 %v3375_v1 }
 0x723   :  { %2143 = vmatpush3.msra.mxu0 %v1559_v9 }
 0x724   :  { %2144 = vmatprep.subr.mxu0 %v3375_v1 }
 0x725   :  { %2145 = vmatpush3.msra.mxu0 %v1558_v41 }
 0x726   :  { %2146 = vmatprep.subr.mxu0 %v3375_v1 }
 0x727   :  { %2147 = vmatpush3.msra.mxu0 %v1557_v10 }
 0x728   :  { %2148 = vmatprep.subr.mxu0 %v3375_v1 }
 0x729   :  { %2149 = vmatpush3.msra.mxu0 %v1556_v44 }
 0x72a   :  { %2150 = vmatprep.subr.mxu0 %v3375_v1 }
 0x72b   :  { %2151 = vmatpush3.msra.mxu0 %v1555_v11 }
 0x72c   :  { %2152 = vmatprep.subr.mxu0 %v3375_v1 }
 0x72d   :  { %2153 = vmatpush3.msra.mxu0 %v1554_v47 }
 0x72e   :  { %2154 = vmatprep.subr.mxu0 %v3375_v1 }
 0x72f   :  { %2155 = vmatpush3.msra.mxu0 %v1553_v12 }
 0x730   :  { %2156 = vmatprep.subr.mxu0 %v3375_v1 }
 0x731   :  { %2157 = vmatpush3.msra.mxu0 %v1552_v49 }
 0x732   :  { %2158 = vmatprep.subr.mxu0 %v3375_v1 }
 0x733   :  { %2159 = vmatpush3.msra.mxu0 %v1551_v13 }
 0x734   :  { %2160 = vmatprep.subr.mxu0 %v3375_v1 }
 0x735   :  { %2161 = vmatpush3.msra.mxu0 %v1550_v18 }
 0x736   :  { %2162 = vmatprep.subr.mxu0 %v3375_v1 }
 0x737   :  { %2163 = vmatpush3.msra.mxu0 %v1549_v0 }
 0x738   :  { %2164 = vmatprep.subr.mxu0 %v3375_v1 }
 0x739   :  { %2165 = vmatpush3.msra.mxu0 %v1548_v35 }
 0x73a   :  { %2166 = vmatprep.subr.mxu0 %v3375_v1 }
 0x73b   :  { %2167 = vmatpush3.msra.mxu0 %v1547_v15 }
 0x73c   :  { %2168 = vmatprep.subr.mxu0 %v3375_v1 }
 0x73d   :  { %2169 = vmatpush3.msra.mxu0 %v1546_v19 }
 0x73e   :  { %2170 = vmatprep.subr.mxu0 %v3375_v1 }
 0x73f   :  { %2171 = vmatpush3.msra.mxu0 %v1545_v20 }
 0x7e0   :  { %v1435_v6 = vpop.f32.mrf.mxu0  ;;  %v1506_v22 = vpop.f32.mrf.mxu1 }
 0x7e1   :  { %v1510_v23 = vadd.f32 %v1435_v6, %v1366_v21  ;;  %v1524_v1 = vadd.f32 %v3232_v50, %v1506_v22  ;;  %v1706_v50 = vld [vmem:[%s3349_s6] ss:$0 sm:$0xff] }
 0x7e2   :  { %v2139_v26 = vpop.f32.mrf.mxu1  ;;  %v1437_v25 = vpop.f32.mrf.mxu0 }
 0x7e3   :  { %v1703_v17 = vmul.f32 -1.442695, %v1510_v23  ;;  %v1517_v27 = vadd.f32 %v1437_v25, %v1367_v24 }
 0x7e5   :  { %2259 = vpow2.f32 %v1703_v17  ;;  %v1704_v28 = vmul.f32 -1.442695, %v1517_v27 }
 0x7e7   :  { %2261 = vpow2.f32 %v1704_v28 }
 0x7f2   :  { %v2260_v29 = vpop.eup %2259 }
 0x7f3   :  { %v1514_v30 = vadd.f32 1.0, %v2260_v29 }
 0x7f4   :  { %v2262_v31 = vpop.eup %2261 }
 0x7f5   :  { %2263 = vrcp.f32 %v1514_v30  ;;  %v1521_v32 = vadd.f32 1.0, %v2262_v31 }
 0x7f7   :  { %2265 = vrcp.f32 %v1521_v32 }
 0x802   :  { %v2264_v33 = vpop.eup %2263 }
 0x803   :  { %v1525_v14 = vmul.f32 %v2264_v33, %v1524_v1 }
 0x804   :  { %v2266_v36 = vpop.eup %2265 }
 0x805   :  { %v1526_v16 = vadd.f32 %v1525_v14, %v1368_v3  ;;  %v1528_v38 = vsub.f32 1.0, %v2266_v36  ;;  %v1530_v43 = vmul.f32 %v2266_v36, %v3310_v8 }
 0x807   :  { %2267 = vtanh.f32 %v1526_v16 }
 0x814   :  { %v2268_v40 = vpop.eup %2267 }
 0x815   :  { %v1529_v45 = vmul.f32 %v2268_v40, %v1528_v38 }
 0x817   :  { %v1531_v52 = vadd.f32 %v1530_v43, %v1529_v45 }
 0x819   :  { %v1540_v53 = vsel %vm1539_vm0, %v1531_v52, %v3310_v8 }
 0x81a   :  { %2173 = vmatmul.mubr.f32.vlgmr.msra.gmra.mxu0 %v1540_v53  ;;  %1650 = vst [vmem:[#allocation10] sm:$0xff] %v1540_v53 }
 0x8da   :  { %v1634_v62 = vpop.f32.mrf.mxu0 }
 0x8db   :  { %v1635_v56 = vadd.f32 %v1706_v50, %v1634_v62 }
 0x8dc   :  { %v2174_v58 = vpop.f32.mrf.mxu0 }
 0x8dd   :  { %1638 = vmax.xlane.f32.xlu0 %v1635_v56 }
 0x966   :  { %v1639_v39 = vpop.xlane.xlu0 %1638 }
 0x967   :  { %v1640_v2 = vsub.f32 %v1635_v56, %v1639_v39 }
 0x969   :  { %v1641_v55 = vmul.f32 1.442695, %v1640_v2 }
 0x96b   :  { %2269 = vpow2.f32 %v1641_v55 }
 0x978   :  { %v2270_v57 = vpop.eup %2269 }
 0x979   :  { %1643 = vadd.xlane.f32.xlu1 %v2270_v57 }
 0x97a   :  { %2393 = shalt.err (!%p2390_p5)
}
 0x97b   :  { %1670 = dma.vmem_to_hbm [thread:$0]  %s1668_s29, 128, %s3351_s8, [#allocation11]  }
 0x97c   :  { %s2441_s10 = smov [#allocation9]  }
 0x97d   :  { %s1657_s11 = sshll.u32 %s2441_s10, 4  ;;  %s1658_s11 = int_to_ptr.vmem [resolvable:$true] %s1657_s11 }
 0x97e   :  { %s2402_s12 = scalar_lea.vmem %s1658_s11, 128  ;;  %p2407_p7 = scmp.lt.s32.totalorder %s1658_s11, %s1658_s11 }
 0x97f   :  { %p2403_p6 = scmp.ne.s32.totalorder %s1658_s11, %s2402_s12  ;;  %p2408_p8 = scmp.lt.s32.totalorder %s2402_s12, %s2402_s12 }
 0x981   :  { %p2409_p9 = por %p2408_p8, %p2407_p7 }
 0x983   :  { %p2410_p10 = pnand %p2409_p9, %p2403_p6 }
 0xa02   :  { %v1644_v46 = vpop.xlane.xlu1 %1643 }
 0xa03   :  { %2271 = vlog2.f32 %v1644_v46 }
 0xa10   :  { %v2272_v63 = vpop.eup %2271 }
 0xa11   :  { %v1646_v59 = vmul.f32 0.6931472, %v2272_v63 }
 0xa13   :  { %v1647_v60 = vadd.f32 %v1646_v59, %v1639_v39 }
 0xa15   :  { %v1648_v61 = vsub.f32 %v1635_v56, %v1647_v60 }
 0xa17   :  { %1649 = vst [vmem:[#allocation9] sm:$0xff] %v1648_v61 }
 0xa18   :  { %2413 = shalt.err (!%p2410_p10)
}
 0xa19   :  { %1660 = dma.vmem_to_hbm [thread:$0]  %s1658_s11, 128, %s3350_s7, [#allocation5]  }
 0xa1a   :  { %2426 = dma.done.wait [#allocation5], 128  }
 0xa1b   :  { %2427 = vsyncadd [#allocation5], 4294967168 }
 0xa1c   :  { %2428 = dma.done.wait [#allocation11], 128  }
 0xa1d   :  { %2429 = vsyncadd [#allocation11], 4294967168 }
 0xa1e   :  { %1677 = vsyncpa [#allocation4], 1 }
 0xa1f   :  { %1678 = vsyncpa [#allocation7], 1 }
 0xa20   :  { %1679 = vsyncpa [#allocation5], 1 }
 0xa21   :  { %1680 = vsyncpa [#allocation11], 1 }

</bundles_post_ra>
